<compile_context>
chip_gen: v6e
topology: v6e:2x2x1
jax: 0.10.0
libtpu: 0.0.40
codegen_flags: <defaults>
</compile_context>

<pallas_src>
import functools

import jax
import jax.numpy as jnp
from jax.experimental import pallas as pl
from jax.experimental.pallas import tpu as pltpu


# ----------------------------------------------------------------------------
# Pallas kernel: one fused conv-as-matmul (all 4 gates) + bias + LSTM gate math.
# ----------------------------------------------------------------------------
def convlstm_kernel(p_ref, w_ref, b_ref, c_ref, peep_ref, out_ref):
    hidden = c_ref.shape[-1]

    # One MXU push for all four gate pre-activations (f32 accumulation); the conv bias
    # is one broadcast VPU add, hidden under the MXU/DMA.
    g = jnp.dot(p_ref[...], w_ref[...], preferred_element_type=jnp.float32)
    g = g + b_ref[...]                                   # (TN, 4*Ch)

    c = c_ref[...]                                       # (TN, Ch) f32
    peep = peep_ref[...]                                 # (TN, 3*Ch) = [Wci | Wcf | Wco]

    # Gate column order is (i, f, c, o).  Fuse the i/f sigmoid into a single 2*Ch-lane
    # pass (peephole adds applied before the activation); the o gate needs a separate
    # sigmoid because its peephole term depends on the new cell state cc.
    c2 = jnp.concatenate([c, c], axis=-1)                # (TN, 2*Ch)
    if_act = jax.nn.sigmoid(g[:, :2 * hidden] + c2 * peep[:, :2 * hidden])
    ci = if_act[:, :hidden]
    cf = if_act[:, hidden:2 * hidden]

    cc = cf * c + ci * jnp.tanh(g[:, 2 * hidden:3 * hidden])
    co = jax.nn.sigmoid(g[:, 3 * hidden:4 * hidden] + cc * peep[:, 2 * hidden:3 * hidden])
    ch = co * jnp.tanh(cc)

    # Two direct slice stores (no in-kernel lane-concatenate of [ch | cc]).
    out_ref[:, :hidden] = ch
    out_ref[:, hidden:] = cc


# ----------------------------------------------------------------------------
# Glue: im2col, fused weight packing, tiling / VMEM policy.
# ----------------------------------------------------------------------------
def _im2col_nhwc(x_nhwc, k, pad):
    """(B,H,W,C) -> (B*H*W, k*k*C) patches, 'same' padding, stride 1.
    Tap-major, channel-minor feature ordering (matches _pack_fused_gate_weight)."""
    B, H, W, C = x_nhwc.shape
    xp = jnp.pad(x_nhwc, ((0, 0), (pad, pad), (pad, pad), (0, 0)))
    patches = []
    for dy in range(k):
        for dx in range(k):
            patches.append(xp[:, dy:dy + H, dx:dx + W, :])
    return jnp.concatenate(patches, axis=-1).reshape(B * H * W, k * k * C)


def _pack_fused_gate_weight(wx_oihw, wh_oihw):
    """PyTorch (O,Ix,kh,kw) + (O,Ih,kh,kw) conv weights -> (kh*kw*(Ix+Ih), O) matmul
    weight matching the fused-(x|h) im2col patch ordering."""
    kh, kw = wx_oihw.shape[2], wx_oihw.shape[3]
    wx_t = jnp.transpose(wx_oihw, (2, 3, 1, 0))   # (kh, kw, Ix, O)
    wh_t = jnp.transpose(wh_oihw, (2, 3, 1, 0))   # (kh, kw, Ih, O)
    w = jnp.concatenate([wx_t, wh_t], axis=2)     # (kh, kw, Ix+Ih, O)
    return w.reshape(kh * kw * w.shape[2], wx_oihw.shape[0])


def _tpu_generation():
    """(per-core VMEM capacity bytes, assumed TensorCores per chip).
    64 MiB per-TC VMEM is the v7x signature (2 TCs/chip); v5e/v6e report 128 MiB (1 TC)."""
    vmem_cap = None
    try:
        vmem_cap = int(pltpu.get_tpu_info().vmem_capacity_bytes)
    except Exception:
        vmem_cap = None
    if vmem_cap is None or vmem_cap <= 0:
        vmem_cap = 64 * 1024 * 1024            # conservative fallback
    cores = 2 if vmem_cap <= 64 * 1024 * 1024 else 1
    return vmem_cap, cores


def _choose_tile(N, HW, num_cores):
    """Largest row tile that divides N and stays aligned with the spatial extent (so the
    peephole block index is well defined).  On dual-TensorCore chips prefer >= 2 grid
    steps per core (so BlockSpec double-buffering can hide the patch DMA on each core);
    on single-core chips the grid is a serial loop, so the largest tile wins — each
    extra step only adds ~0.35 us of fixed overhead."""
    cands = [tn for tn in (2048, 1024, 512, 256, 128, 64, 32, 16, 8)
             if N % tn == 0 and (HW % tn == 0 or tn % HW == 0)]
    if not cands:
        raise ValueError(f"cannot tile N={N} with HW={HW}")
    if num_cores >= 2:
        for tn in cands:                        # descending
            steps = N // tn
            if steps % num_cores == 0 and steps >= 2 * num_cores:
                return tn
        for tn in cands:
            if N // tn >= num_cores:
                return tn
    return cands[0]


def pack_convlstm_params(params, kernel_size):
    """Pack parameters ONCE per sequence (not per step): fused bf16 gate weight,
    f32 bias row, stacked spatial peephole weights, plus static geometry."""
    Ch = params["Whi"].shape[0]
    Cin = params["Wxi"].shape[1]
    H, W = params["Wci"].shape[2], params["Wci"].shape[3]
    k = kernel_size
    w = jnp.concatenate(
        [_pack_fused_gate_weight(params["Wx" + g], params["Wh" + g])
         for g in ("i", "f", "c", "o")], axis=-1).astype(jnp.bfloat16)      # (K, 4*Ch)
    bias = jnp.concatenate([params["bx" + g] for g in ("i", "f", "c", "o")],
                           axis=-1).reshape(1, 4 * Ch).astype(jnp.float32)  # (1, 4*Ch)
    peep = jnp.concatenate(
        [jnp.transpose(params[n], (0, 2, 3, 1)).reshape(H * W, Ch)
         for n in ("Wci", "Wcf", "Wco")], axis=-1).astype(jnp.float32)      # (HW, 3*Ch)
    return dict(w=w, bias=bias, peep=peep, H=H, W=W, Cin=Cin, Ch=Ch,
                k=k, pad=(k - 1) // 2)


def conv_lstm_cell_flat(x_flat, h_flat, c_flat, packed):
    """One ConvLSTM step in flattened-NHWC layout.

    x_flat: (B*H*W, Cin); h_flat, c_flat: (B*H*W, Ch).  Returns (ch, cc), both
    (B*H*W, Ch) float32, so recurrent callers never touch NCHW between steps."""
    H, W, Cin, Ch = packed["H"], packed["W"], packed["Cin"], packed["Ch"]
    k, pad = packed["k"], packed["pad"]
    HW = H * W
    N = x_flat.shape[0]
    B = N // HW

    # Channel-concat x|h and cast to bf16 BEFORE im2col so the k*k-expanded patch
    # stream (the dominant HBM byte stream) is half width.
    xh = jnp.concatenate([x_flat.astype(jnp.bfloat16),
                          h_flat.astype(jnp.bfloat16)],
                         axis=-1).reshape(B, H, W, Cin + Ch)
    patches = _im2col_nhwc(xh, k, pad)                  # (N, K) bf16, natural K
    K = patches.shape[-1]
    c_flat = c_flat.astype(jnp.float32)

    vmem_cap, cores = _tpu_generation()
    TN = _choose_tile(N, HW, cores)
    grid = (N // TN,)

    peep = packed["peep"]                               # (HW, 3*Ch) f32
    if TN <= HW:
        n_sp = HW // TN
        if n_sp == 1:
            peep_spec = pl.BlockSpec((TN, 3 * Ch), lambda i: (0, 0))
        else:
            peep_spec = pl.BlockSpec((TN, 3 * Ch), lambda i: (i % n_sp, 0))
        peep_in = peep
    else:
        # Tile spans several full spatial maps: replicate only up to one tile.
        peep_in = jnp.tile(peep, (TN // HW, 1))
        peep_spec = pl.BlockSpec((TN, 3 * Ch), lambda i: (0, 0))

    # Generation-aware VMEM budget: double-buffered blocks + headroom, capped at ~80%
    # of the physical per-core VMEM (<= ~51 MiB on v7x, up to ~102 MiB on v5e/v6e).
    block_bytes = (TN * K * 2 + K * 4 * Ch * 2 + 4 * Ch * 4
                   + TN * Ch * 4 + TN * 3 * Ch * 4 + TN * 2 * Ch * 4)
    vmem_limit = int(min(max(4 * block_bytes, 8 * 1024 * 1024), (vmem_cap * 4) // 5))

    cost = pl.CostEstimate(
        flops=2 * N * K * 4 * Ch,
        transcendentals=5 * N * Ch,
        bytes_accessed=(patches.size * 2 + packed["w"].size * 2 + packed["bias"].size * 4
                        + c_flat.size * 4 + peep_in.size * 4 + N * 2 * Ch * 4),
    )

    grid_spec = pltpu.PrefetchScalarGridSpec(
        num_scalar_prefetch=0,
        grid=grid,
        in_specs=[
            pl.BlockSpec((TN, K), lambda i: (i, 0)),        # bf16 fused (x|h) patches
            # Constant block index: weight and bias stay resident in VMEM across steps.
            pl.BlockSpec((K, 4 * Ch), lambda i: (0, 0)),
            pl.BlockSpec((1, 4 * Ch), lambda i: (0, 0)),
            pl.BlockSpec((TN, Ch), lambda i: (i, 0)),       # cell state c (f32)
            peep_spec,                                      # stacked peepholes
        ],
        out_specs=pl.BlockSpec((TN, 2 * Ch), lambda i: (i, 0)),
    )

    out = pl.pallas_call(
        convlstm_kernel,
        out_shape=jax.ShapeDtypeStruct((N, 2 * Ch), jnp.float32),
        grid_spec=grid_spec,
        compiler_params=pltpu.CompilerParams(
            dimension_semantics=("parallel",),
            vmem_limit_bytes=vmem_limit),
        cost_estimate=cost,
    )(patches, packed["w"], packed["bias"], c_flat, peep_in)

    return out[:, :Ch], out[:, Ch:]


def conv_lstm_cell_pallas(x_nchw, h_nchw, c_nchw, params, kernel_size):
    """Drop-in single-step forward (NCHW in / NCHW out, f32), matching the module.
    For recurrent use, prefer pack_convlstm_params + conv_lstm_cell_flat so layout
    conversion and parameter packing happen only at sequence boundaries."""
    B, _, H, W = x_nchw.shape
    packed = pack_convlstm_params(params, kernel_size)

    def to_flat(a):
        return jnp.transpose(a, (0, 2, 3, 1)).reshape(B * H * W, a.shape[1])

    ch_f, cc_f = conv_lstm_cell_flat(to_flat(x_nchw), to_flat(h_nchw),
                                     to_flat(c_nchw), packed)

    def to_nchw(a):
        return jnp.transpose(a.reshape(B, H, W, -1), (0, 3, 1, 2))

    return to_nchw(ch_f), to_nchw(cc_f)


# ----------------------------------------------------------------------------
# Pure-JAX reference (NCHW, lax.conv) for validation.
# `operand_dtype=jnp.bfloat16` reproduces the kernel's MXU-operand precision
# (conv operands/weights rounded to bf16; bias, peephole, accumulation and all
# elementwise gate math in f32).
# ----------------------------------------------------------------------------
def conv_lstm_cell_ref(x, h, c, p, k, operand_dtype=jnp.float32):
    pad = (k - 1) // 2

    def rnd(a):
        return a.astype(operand_dtype).astype(jnp.float32)

    def conv(inp, w, b=None):
        out = jax.lax.conv_general_dilated(
            rnd(inp), rnd(w), window_strides=(1, 1),
            padding=[(pad, pad), (pad, pad)],
            dimension_numbers=("NCHW", "OIHW", "NCHW"),
            preferred_element_type=jnp.float32)
        if b is not None:
            out = out + b[None, :, None, None]   # bias stays f32 (kernel adds it in f32)
        return out

    ci = jax.nn.sigmoid(conv(x, p["Wxi"], p["bxi"]) + conv(h, p["Whi"]) + c * p["Wci"])
    cf = jax.nn.sigmoid(conv(x, p["Wxf"], p["bxf"]) + conv(h, p["Whf"]) + c * p["Wcf"])
    cc = cf * c + ci * jnp.tanh(conv(x, p["Wxc"], p["bxc"]) + conv(h, p["Whc"]))
    co = jax.nn.sigmoid(conv(x, p["Wxo"], p["bxo"]) + conv(h, p["Who"]) + cc * p["Wco"])
    ch = co * jnp.tanh(cc)
    return ch, cc


# ----------------------------------------------------------------------------
# Main
# ----------------------------------------------------------------------------
if __name__ == "__main__":
    B, Cin, H, W = 2, 4, 16, 16
    hidden = 32            # must be even (asserted in the PyTorch module)
    k = 3

    key = jax.random.PRNGKey(0)
    keys = jax.random.split(key, 16)

    def winit(kk, shape, scale=0.1):
        return jax.random.normal(kk, shape, dtype=jnp.float32) * scale

    params = {
        "Wxi": winit(keys[0], (hidden, Cin, k, k)),
        "Wxf": winit(keys[1], (hidden, Cin, k, k)),
        "Wxc": winit(keys[2], (hidden, Cin, k, k)),
        "Wxo": winit(keys[3], (hidden, Cin, k, k)),
        "bxi": winit(keys[4], (hidden,)),
        "bxf": winit(keys[5], (hidden,)),
        "bxc": winit(keys[6], (hidden,)),
        "bxo": winit(keys[7], (hidden,)),
        "Whi": winit(keys[8], (hidden, hidden, k, k)),
        "Whf": winit(keys[9], (hidden, hidden, k, k)),
        "Whc": winit(keys[10], (hidden, hidden, k, k)),
        "Who": winit(keys[11], (hidden, hidden, k, k)),
        # Peephole weights: zeros at init, exactly like the PyTorch module.
        "Wci": jnp.zeros((1, hidden, H, W), jnp.float32),
        "Wcf": jnp.zeros((1, hidden, H, W), jnp.float32),
        "Wco": jnp.zeros((1, hidden, H, W), jnp.float32),
    }

    x = jax.random.normal(keys[12], (B, Cin, H, W), dtype=jnp.float32)
    h0 = jax.random.normal(keys[13], (B, hidden, H, W), dtype=jnp.float32)
    c0 = jax.random.normal(keys[14], (B, hidden, H, W), dtype=jnp.float32)

    # ---- single step, drop-in NCHW API ----
    fwd = jax.jit(functools.partial(conv_lstm_cell_pallas, kernel_size=k))
    ch, cc = fwd(x, h0, c0, params)
    jax.block_until_ready((ch, cc))

    ch_ref, cc_ref = conv_lstm_cell_ref(x, h0, c0, params, k, operand_dtype=jnp.bfloat16)
    assert ch.shape == (B, hidden, H, W) and cc.shape == (B, hidden, H, W)
    assert jnp.allclose(ch, ch_ref, atol=1e-3, rtol=1e-3)
    assert jnp.allclose(cc, cc_ref, atol=1e-3, rtol=1e-3)

    # ---- short sequence: flat-NHWC recurrence, layout conversion and parameter
    #      packing only at the sequence boundaries (per the perf feedback), plus a
    #      multi-step drift check against the reference. ----
    T = 4
    xs = jax.random.normal(keys[15], (T, B, Cin, H, W), dtype=jnp.float32)

    @jax.jit
    def run_sequence(xs_nchw, h_nchw, c_nchw, prm):
        packed = pack_convlstm_params(prm, k)
        xs_flat = jnp.transpose(xs_nchw, (0, 1, 3, 4, 2)).reshape(T, B * H * W, Cin)
        hf = jnp.transpose(h_nchw, (0, 2, 3, 1)).reshape(B * H * W, hidden)
        cf = jnp.transpose(c_nchw, (0, 2, 3, 1)).reshape(B * H * W, hidden)
        for t in range(T):
            hf, cf = conv_lstm_cell_flat(xs_flat[t], hf, cf, packed)
        to_nchw = lambda a: jnp.transpose(a.reshape(B, H, W, hidden), (0, 3, 1, 2))
        return to_nchw(hf), to_nchw(cf)

    hs, cs = run_sequence(xs, h0, c0, params)
    jax.block_until_ready((hs, cs))

    hr, cr = h0, c0
    for t in range(T):
        hr, cr = conv_lstm_cell_ref(xs[t], hr, cr, params, k, operand_dtype=jnp.bfloat16)
    assert jnp.allclose(hs, hr, atol=3e-3, rtol=3e-3)
    assert jnp.allclose(cs, cr, atol=3e-3, rtol=3e-3)

    print("KERNEL_OK")
</pallas_src>

<mosaic_0001>
module attributes {stable_mosaic.version = 11 : i64} {
  func.func @convlstm_kernel(%arg0: i32, %arg1: memref<128x324xbf16, #tpu.memory_space<vmem>>, %arg2: memref<324x128xbf16, #tpu.memory_space<vmem>>, %arg3: memref<1x128xf32, #tpu.memory_space<vmem>>, %arg4: memref<128x32xf32, #tpu.memory_space<vmem>>, %arg5: memref<128x96xf32, #tpu.memory_space<vmem>>, %arg6: memref<128x64xf32, #tpu.memory_space<vmem>>) attributes {dimension_semantics = [#tpu.dimension_semantics<parallel>], iteration_bounds = array<i64: 4>, scalar_prefetch = 0 : i64, scratch_operands = 0 : i64, tpu.core_type = #tpu.core_type<tc>, window_params = [{transform_indices = @transform_0, window_bounds = array<i64: 128, 324>}, {pipeline_mode = #tpu.pipeline_mode<synchronous>, transform_indices = @transform_1, window_bounds = array<i64: 324, 128>}, {pipeline_mode = #tpu.pipeline_mode<synchronous>, transform_indices = @transform_2, window_bounds = array<i64: 1, 128>}, {transform_indices = @transform_3, window_bounds = array<i64: 128, 32>}, {transform_indices = @transform_4, window_bounds = array<i64: 128, 96>}, {transform_indices = @transform_5, window_bounds = array<i64: 128, 64>}]} {
    %c0 = arith.constant 0 : index
    %c0_0 = arith.constant 0 : index
    %0 = vector.load %arg1[%c0, %c0_0] : memref<128x324xbf16, #tpu.memory_space<vmem>>, vector<128x324xbf16>
    %c0_1 = arith.constant 0 : index
    %c0_2 = arith.constant 0 : index
    %1 = vector.load %arg2[%c0_1, %c0_2] : memref<324x128xbf16, #tpu.memory_space<vmem>>, vector<324x128xbf16>
    %cst = arith.constant dense<0.000000e+00> : vector<128x128xf32>
    %2 = tpu.matmul %0, %1, %cst {dimension_numbers = #tpu.dot_dimension_numbers<[1], [0], [0], [1], [0, 0, 1, 1], [], []>} : vector<128x324xbf16>, vector<324x128xbf16>, vector<128x128xf32> -> vector<128x128xf32>
    %c0_3 = arith.constant 0 : index
    %c0_4 = arith.constant 0 : index
    %3 = vector.load %arg3[%c0_3, %c0_4] : memref<1x128xf32, #tpu.memory_space<vmem>>, vector<1x128xf32>
    %4 = vector.broadcast %3 : vector<1x128xf32> to vector<128x128xf32>
    %5 = arith.addf %2, %4 : vector<128x128xf32>
    %c0_5 = arith.constant 0 : index
    %c0_6 = arith.constant 0 : index
    %6 = vector.load %arg4[%c0_5, %c0_6] : memref<128x32xf32, #tpu.memory_space<vmem>>, vector<128x32xf32>
    %c0_7 = arith.constant 0 : index
    %c0_8 = arith.constant 0 : index
    %7 = vector.load %arg5[%c0_7, %c0_8] : memref<128x96xf32, #tpu.memory_space<vmem>>, vector<128x96xf32>
    %8 = tpu.concatenate %6, %6 in 1 : vector<128x32xf32>, vector<128x32xf32> -> vector<128x64xf32>
    %9 = vector.extract_strided_slice %5 {offsets = [0, 0], sizes = [128, 64], strides = [1, 1]} : vector<128x128xf32> to vector<128x64xf32>
    %10 = vector.extract_strided_slice %7 {offsets = [0, 0], sizes = [128, 64], strides = [1, 1]} : vector<128x96xf32> to vector<128x64xf32>
    %11 = arith.mulf %8, %10 : vector<128x64xf32>
    %12 = arith.addf %9, %11 : vector<128x64xf32>
    %13 = arith.negf %12 : vector<128x64xf32>
    %14 = math.exp %13 : vector<128x64xf32>
    %cst_9 = arith.constant 1.000000e+00 : f32
    %15 = vector.broadcast %cst_9 : f32 to vector<128x64xf32>
    %16 = arith.addf %15, %14 : vector<128x64xf32>
    %17 = arith.divf %15, %16 : vector<128x64xf32>
    %18 = vector.extract_strided_slice %17 {offsets = [0, 0], sizes = [128, 32], strides = [1, 1]} : vector<128x64xf32> to vector<128x32xf32>
    %19 = vector.extract_strided_slice %17 {offsets = [0, 32], sizes = [128, 32], strides = [1, 1]} : vector<128x64xf32> to vector<128x32xf32>
    %20 = arith.mulf %19, %6 : vector<128x32xf32>
    %21 = vector.extract_strided_slice %5 {offsets = [0, 64], sizes = [128, 32], strides = [1, 1]} : vector<128x128xf32> to vector<128x32xf32>
    %22 = math.tanh %21 : vector<128x32xf32>
    %23 = arith.mulf %18, %22 : vector<128x32xf32>
    %24 = arith.addf %20, %23 : vector<128x32xf32>
    %25 = vector.extract_strided_slice %5 {offsets = [0, 96], sizes = [128, 32], strides = [1, 1]} : vector<128x128xf32> to vector<128x32xf32>
    %26 = vector.extract_strided_slice %7 {offsets = [0, 64], sizes = [128, 32], strides = [1, 1]} : vector<128x96xf32> to vector<128x32xf32>
    %27 = arith.mulf %24, %26 : vector<128x32xf32>
    %28 = arith.addf %25, %27 : vector<128x32xf32>
    %29 = arith.negf %28 : vector<128x32xf32>
    %30 = math.exp %29 : vector<128x32xf32>
    %cst_10 = arith.constant 1.000000e+00 : f32
    %31 = vector.broadcast %cst_10 : f32 to vector<128x32xf32>
    %32 = arith.addf %31, %30 : vector<128x32xf32>
    %33 = arith.divf %31, %32 : vector<128x32xf32>
    %34 = math.tanh %24 : vector<128x32xf32>
    %35 = arith.mulf %33, %34 : vector<128x32xf32>
    %c0_11 = arith.constant 0 : index
    %c0_12 = arith.constant 0 : index
    %36 = vector.load %arg6[%c0_11, %c0_12] : memref<128x64xf32, #tpu.memory_space<vmem>>, vector<128x32xf32>
    tpu.vector_store %arg6[%c0_11, %c0_12], %35 {strides = array<i32>} : memref<128x64xf32, #tpu.memory_space<vmem>>, vector<128x32xf32>,
    %c0_13 = arith.constant 0 : index
    %c32 = arith.constant 32 : index
    %37 = vector.load %arg6[%c0_13, %c32] : memref<128x64xf32, #tpu.memory_space<vmem>>, vector<128x32xf32>
    tpu.vector_store %arg6[%c0_13, %c32], %24 {strides = array<i32>} : memref<128x64xf32, #tpu.memory_space<vmem>>, vector<128x32xf32>,
    return
  }
  func.func @transform_0(%arg0: i32) -> (i32, i32) {
    %c0_i32 = arith.constant 0 : i32
    %c0_i32_0 = arith.constant 0 : i32
    return %arg0, %c0_i32 : i32, i32
  }
  func.func @transform_1(%arg0: i32) -> (i32, i32) {
    %c0_i32 = arith.constant 0 : i32
    %c0_i32_0 = arith.constant 0 : i32
    %c0_i32_1 = arith.constant 0 : i32
    return %c0_i32, %c0_i32_0 : i32, i32
  }
  func.func @transform_2(%arg0: i32) -> (i32, i32) {
    %c0_i32 = arith.constant 0 : i32
    %c0_i32_0 = arith.constant 0 : i32
    %c0_i32_1 = arith.constant 0 : i32
    return %c0_i32, %c0_i32_0 : i32, i32
  }
  func.func @transform_3(%arg0: i32) -> (i32, i32) {
    %c0_i32 = arith.constant 0 : i32
    %c0_i32_0 = arith.constant 0 : i32
    return %arg0, %c0_i32 : i32, i32
  }
  func.func @transform_4(%arg0: i32) -> (i32, i32) {
    %c2_i32 = arith.constant 2 : i32
    %c0_i32 = arith.constant 0 : i32
    %0 = arith.cmpi eq, %c2_i32, %c0_i32 : i32
    %c1_i32 = arith.constant 1 : i32
    %1 = arith.select %0, %c1_i32, %c2_i32 : i32
    %2 = arith.remsi %arg0, %1 : i32
    %c0_i32_0 = arith.constant 0 : i32
    %3 = arith.cmpi ne, %2, %c0_i32_0 : i32
    %c0_i32_1 = arith.constant 0 : i32
    %4 = arith.cmpi slt, %2, %c0_i32_1 : i32
    %c0_i32_2 = arith.constant 0 : i32
    %5 = arith.cmpi slt, %1, %c0_i32_2 : i32
    %6 = arith.xori %4, %5 : i1
    %7 = arith.andi %6, %3 : i1
    %8 = arith.addi %2, %1 : i32
    %9 = arith.select %7, %8, %2 : i32
    %c0_i32_3 = arith.constant 0 : i32
    %c0_i32_4 = arith.constant 0 : i32
    return %9, %c0_i32_3 : i32, i32
  }
  func.func @transform_5(%arg0: i32) -> (i32, i32) {
    %c0_i32 = arith.constant 0 : i32
    %c0_i32_0 = arith.constant 0 : i32
    return %arg0, %c0_i32 : i32, i32
  }
}

</mosaic_0001>

<bundles_post_ra>
// kernel: conv_lstm_cell_pallas.1
= control target key start
LH: loop header
LB: loop body
LE: loop exit
PB: predicated region body
PF: predicated region fallthrough
CT: control target
= control target key end

     0   :  { %s2380_s18 = smov 0   ;;  %s3147_s0 = inlined_call_operand.vmem [shape: bf16[512,324], index: 0, kind: input, shape index: {}]   ;;  %s3148_s1 = inlined_call_operand.vmem [shape: bf16[324,128], index: 1, kind: input, shape index: {}]   ;;  %s3149_s2 = inlined_call_operand.vmem [shape: f32[1,128], index: 2, kind: input, shape index: {}]   ;;  %s3150_s3 = inlined_call_operand.vmem [shape: f32[512,32], index: 3, kind: input, shape index: {}]   ;;  %s3151_s4 = inlined_call_operand.vmem [shape: f32[256,96], index: 4, kind: input, shape index: {}]   ;;  %s3152_s5 = inlined_call_operand.vmem [shape: f32[512,64], index: 5, kind: output, shape index: {}]  }
   0x1 LB: > { %s2386_s19 = sadd.s32 4294967295, %s2345_s18   ;;  %p1878_p0 = scmp.ge.s32.totalorder %s2345_s18, 1  ;;  %s2345_s18 = sphi %s2380_s18, %s15_s18  }
   0x2   : > { %p259_p1 = scmp.lt.s32.totalorder %s2345_s18, 5 }
   0x4   : > { %p260_p2 = pnand %p1878_p0, %p259_p1 }
   0x6   : > { %263 = sbr.rel (%p260_p2) target bundleno = 825 (0x339), region = 40 }
   0xb   : > { %v2094_v0 = vld [vmem:[%s3148_s1 + $0x78] sm:$0xff]   ;;  %s1879_s24 = sshll.u32 %s2386_s19, 4  ;;  %v2096_v2 = vld [vmem:[%s3148_s1 + $0x70] sm:$0xff]   ;;  %v2098_v4 = vld [vmem:[%s3148_s1 + $0x68] sm:$0xff]   ;;  %vm708_vm0 = vcmask 1041408   ;;  %vm683_vm1 = vcmask 556032  }
   0xc   : > { %v2095_v1 = vld [vmem:[%s3148_s1 + $0x38] sm:$0xff]   ;;  %1978 = vmatprep.subr.bf16.mxu0 %v2094_v0  ;;  %v2097_v3 = vld [vmem:[%s3148_s1 + $0x30] sm:$0xff]   ;;  %p311_p3 = scmp.lt.s32.totalorder %s1879_s24, 63  ;;  %v2099_v5 = vld [vmem:[%s3148_s1 + $0x28] sm:$0xff]   ;;  %s2347_s27 = smov 32   ;;  %vm1002_vm2 = vcmask 261120  }
   0xd   : > { %1979 = vmatpush3.bf16.msra.mxu0 %v2095_v1  ;;  %v2100_v6 = vld [vmem:[%s3148_s1 + $0x60] sm:$0xff]   ;;  %v2102_v9 = vld [vmem:[%s3148_s1 + $0x58] sm:$0xff]   ;;  %v2109_v13 = vld [vmem:[%s3148_s1 + $0x90] sm:$0xff]   ;;  %s324_s6 = ssub.s32 0, %s2386_s19  ;;  %p323_p4 = scmp.lt.s32.totalorder %s2386_s19, 0  ;;  %vm1771_vm3 = vcmask 523520  }
   0xe   : > { %1980 = vmatprep.subr.bf16.mxu0 %v2096_v2  ;;  %s3178_s24 = smov (!%p311_p3, %s1879_s24), 63  ;;  %v2101_v7 = vld [vmem:[%s3148_s1 + $0x20] sm:$0xff]   ;;  %v2106_v11 = vld [vmem:[%s3148_s1 + $0x98] sm:$0xff]   ;;  %v2105_v14 = vld [vmem:[%s3148_s1 + $0x50] sm:$0xff]   ;;  %s1883_s7 = smin.u32 %s2386_s19, %s324_s6 }
   0xf   : > { %v2103_v8 = vld [vmem:[%s3148_s1 + $0xa0] ss:$0 sps:$4 sm:$0x33]   ;;  %s2082_s20 = smul.u32 12, %s3178_s24  ;;  %v2104_v12 = vld [vmem:[%s3148_s1 + $0x18] sm:$0xff]   ;;  %v2112_v15 = vld [vmem:[%s3148_s1 + $0x88] sm:$0xff]  }
  0x10   : > { %2081 = vmatprep.subr.msk.bf16.mxu1 %vm708_vm0, %v2103_v8  ;;  %v710_v10 = vsel %vm708_vm0, %v2103_v8, 0  ;;  %v2107_v16 = vld [vmem:[%s3148_s1 + $0x10] sm:$0xff]   ;;  %v2108_v17 = vld [vmem:[%s3148_s1 + $0x48] sm:$0xff]   ;;  %v2117_v19 = vld [vmem:[%s3148_s1 + $0x80] sm:$0xff]   ;;  %s1882_s22 = sshll.u32 %s3178_s24, 3  ;;  %s326_s8 = sand.u32 1, %s1883_s7  }
  0x11   : > { %1981 = vmatpush3.bf16.msra.mxu0 %v2097_v3  ;;  %2056 = vmatpush3.bf16.msra.mxu1 %v710_v10  ;;  %s2439_s30 = scalar_lea.vmem %s3147_s0, %s2082_s20  ;;  %v2110_v21 = vld [vmem:[%s3148_s1 + $0x8] sm:$0xff]   ;;  %v2111_v22 = vld [vmem:[%s3148_s1 + $0x40] sm:$0xff]   ;;  %s2479_s26 = scalar_lea.vmem %s3150_s3, %s1882_s22 }
  0x12   : > { %1982 = vmatprep.subr.bf16.mxu0 %v2098_v4  ;;  %2057 = vmatprep.subr.bf16.mxu1 %v2106_v11  ;;  %v2116_v18 = vld [vmem:[%s2439_s30 + $0x4] ss:$12 sps:$4 sm:$0xff]   ;;  %v2118_v20 = vld [vmem:[%s2439_s30 + $0x8] ss:$12 sps:$4 sm:$0xff]   ;;  %v2119_v24 = vld [vmem:[%s2439_s30 + $0x20] ss:$12 sps:$4 sm:$0xff]   ;;  %s3062_s20 = scalar_lea.vmem %s3152_s5, %s1882_s22 }
  0x13   : > { %744 = vmatprep.mubr.bf16.mxu0 %v2116_v18  ;;  %2065 = vmatprep.mubr.msk.bf16.mxu1 %vm683_vm1, %v2118_v20  ;;  %v2113_v23 = vld [vmem:[%s3148_s1] sm:$0xff]   ;;  %v2120_v27 = vld [vmem:[%s2439_s30 + $0x1c] ss:$12 sps:$4 sm:$0xff]   ;;  %v2491_v33 = vld [vmem:[%s2479_s26 + $0x10] sm:$0xff]  ;;  %s327_s9 = ssub.s32 0, %s326_s8  ;;  %s2349_s15 = smov 96  }
  0x14   : > { %v2126_v25 = vld [vmem:[%s2439_s30 + $0x38] ss:$12 sps:$4 sm:$0xff]   ;;  %v2114_v26 = vld [vmem:[%s2439_s30] ss:$12 sps:$4 sm:$0xff]   ;;  %v2127_v28 = vld [vmem:[%s2439_s30 + $0x50] ss:$12 sps:$4 sm:$0xff]   ;;  %958 = vrot.lane.b32.xlu1 %v2491_v33, %s2347_s27  ;;  %s3180_s9 = smov (!%p323_p4, %s327_s9), %s326_s8 }
  0x15   : > { %1983 = vmatpush3.bf16.msra.mxu0 %v2099_v5  ;;  %2058 = vmatpush3.bf16.msra.mxu1 %v2106_v11  ;;  %v2134_v29 = vld [vmem:[%s2439_s30 + $0x68] ss:$12 sps:$4 sm:$0xff]   ;;  %v2122_v30 = vld [vmem:[%s2439_s30 + $0x18] ss:$12 sps:$4 sm:$0xff]   ;;  %v2135_v36 = vld [vmem:[%s2439_s30 + $0x80] ss:$12 sps:$4 sm:$0xff]  }
  0x16   : > { %1984 = vmatprep.subr.bf16.mxu0 %v2100_v6  ;;  %2059 = vmatprep.subr.bf16.mxu1 %v2109_v13  ;;  %v2123_v31 = vld [vmem:[%s2439_s30 + $0x34] ss:$12 sps:$4 sm:$0xff]   ;;  %v2494_v34 = vld [vmem:[%s2479_s26 + $0x8] sm:$0xff]  ;;  %v2499_v35 = vld [vmem:[%s2479_s26 + $0x18] sm:$0xff]  ;;  %p1885_p5 = scmp.lt.s32.totalorder %s3180_s9, 0  ;;  %s333_s19 = sadd.s32 2, %s3180_s9 }
  0x17   : > { %v2485_v32 = vld [vmem:[%s2479_s26] sm:$0xff]  ;;  %v2125_v39 = vld [vmem:[%s2439_s30 + $0x30] ss:$12 sps:$4 sm:$0xff]   ;;  %v2512_v40 = vld [vmem:[%s2479_s26 + $0x28] sm:$0xff] }
  0x18   : > { %954 = vrot.lane.b32.xlu0 %v2485_v32, %s2347_s27  ;;  %v2142_v37 = vld [vmem:[%s2439_s30 + $0x98] ss:$12 sps:$4 sm:$0xff]   ;;  %960 = vrot.lane.b32.xlu1 %v2499_v35, %s2347_s27  ;;  %v2522_v42 = vld [vmem:[%s2479_s26 + $0x30] sm:$0xff]  ;;  %s3182_s19 = smov (!%p1885_p5, %s333_s19), %s3180_s9 }
  0x19   : > { %1985 = vmatpush3.bf16.msra.mxu0 %v2101_v7  ;;  %2060 = vmatpush3.bf16.msra.mxu1 %v2109_v13  ;;  %v2508_v38 = vld [vmem:[%s2479_s26 + $0x20] sm:$0xff]  ;;  %v2128_v41 = vld [vmem:[%s2439_s30 + $0x4c] ss:$12 sps:$4 sm:$0xff]   ;;  %v2143_v44 = vld [vmem:[%s2439_s30 + $0xb0] ss:$12 sps:$4 sm:$0xff]   ;;  %s1886_s10 = sshll.u32 %s3182_s19, 4 }
  0x1a   : > { %1986 = vmatprep.subr.bf16.mxu0 %v2102_v9  ;;  %2061 = vmatprep.subr.bf16.mxu1 %v2112_v15  ;;  %v2525_v43 = vld [vmem:[%s2479_s26 + $0x38] sm:$0xff]  ;;  %v2533_v45 = vld [vmem:[%s2479_s26 + $0x40] sm:$0xff]  ;;  %v2130_v46 = vld [vmem:[%s2439_s30 + $0x48] ss:$12 sps:$4 sm:$0xff]   ;;  %p336_p6 = scmp.lt.s32.totalorder %s1886_s10, 31 }
  0x1b   : > { %v2537_v47 = vld [vmem:[%s2479_s26 + $0x48] sm:$0xff]  ;;  %v2131_v48 = vld [vmem:[%s2439_s30 + $0x64] ss:$12 sps:$4 sm:$0xff]   ;;  %v2549_v50 = vld [vmem:[%s2479_s26 + $0x58] sm:$0xff] }
  0x1c   : > { %956 = vrot.lane.b32.xlu0 %v2494_v34, %s2347_s27  ;;  %964 = vrot.lane.b32.xlu1 %v2512_v40, %s2347_s27  ;;  %v2546_v49 = vld [vmem:[%s2479_s26 + $0x50] sm:$0xff]  ;;  %v2556_v51 = vld [vmem:[%s2479_s26 + $0x60] sm:$0xff]  ;;  %s3184_s10 = smov (!%p336_p6, %s1886_s10), 31 }
  0x1d   : > { %1987 = vmatpush3.bf16.msra.mxu0 %v2104_v12  ;;  %2062 = vmatpush3.bf16.msra.mxu1 %v2112_v15  ;;  %v2133_v52 = vld [vmem:[%s2439_s30 + $0x60] ss:$12 sps:$4 sm:$0xff]   ;;  %v2136_v54 = vld [vmem:[%s2439_s30 + $0x7c] ss:$12 sps:$4 sm:$0xff]   ;;  %v2568_v55 = vld [vmem:[%s2479_s26 + $0x70] sm:$0xff]  ;;  %s1887_s11 = sshll.u32 %s3184_s10, 3 }
  0x1e   : > { %1988 = vmatprep.subr.bf16.mxu0 %v2105_v14  ;;  %2063 = vmatprep.subr.bf16.mxu1 %v2117_v19  ;;  %v2560_v53 = vld [vmem:[%s2479_s26 + $0x68] sm:$0xff]  ;;  %v2571_v56 = vld [vmem:[%s2479_s26 + $0x78] sm:$0xff]  ;;  %v2139_v58 = vld [vmem:[%s2439_s30 + $0x94] ss:$12 sps:$4 sm:$0xff]   ;;  %s2671_s14 = scalar_lea.vmem %s3151_s4, %s1887_s11 }
  0x1f   : > { %v2138_v57 = vld [vmem:[%s2439_s30 + $0x78] ss:$12 sps:$4 sm:$0xff]   ;;  %v2141_v59 = vld [vmem:[%s2439_s30 + $0x90] ss:$12 sps:$4 sm:$0xff]   ;;  %v2146_v61 = vld [vmem:[%s2439_s30 + $0xa8] ss:$12 sps:$4 sm:$0xff]  }
  0x20   : > { %962 = vrot.lane.b32.xlu0 %v2508_v38, %s2347_s27  ;;  %968 = vrot.lane.b32.xlu1 %v2525_v43, %s2347_s27  ;;  %v2144_v60 = vld [vmem:[%s2439_s30 + $0xac] ss:$12 sps:$4 sm:$0xff]   ;;  %v2585_v2 = vld [vmem:[%s3149_s2] ss:$0 sm:$0xff]  ;;  %s2348_s30 = smov 64  }
  0x21   : > { %1989 = vmatpush3.bf16.msra.mxu0 %v2107_v16  ;;  %2064 = vmatpush3.bf16.msra.mxu1 %v2117_v19 }
  0x22   : > { %1990 = vmatprep.subr.bf16.mxu0 %v2108_v17 }
  0x24   : > { %2066 = vmatmul.mubr.msk.bf16.vlgmr.msra.gmra.mxu1 %vm683_vm1, %v2119_v24  ;;  %966 = vrot.lane.b32.xlu0 %v2522_v42, %s2347_s27 }
  0x25   : > { %1991 = vmatpush3.bf16.msra.mxu0 %v2110_v21  ;;  %2069 = vmatprep.mubr.msk.bf16.mxu1 %vm683_vm1, %v2126_v25 }
  0x26   : > { %1992 = vmatprep.subr.bf16.mxu0 %v2111_v22  ;;  %972 = vrot.lane.b32.xlu1 %v2537_v47, %s2347_s27 }
  0x28   : > { %970 = vrot.lane.b32.xlu0 %v2533_v45, %s2347_s27 }
  0x29   : > { %1993 = vmatpush3.bf16.msra.mxu0 %v2113_v23 }
  0x2a   : > { %976 = vrot.lane.b32.xlu1 %v2549_v50, %s2347_s27 }
  0x2c   : > { %745 = vmatmul.mubr.bf16.vlgmr.msra.gmra.mxu0 %v2114_v26  ;;  %2070 = vmatmul.mubr.msk.bf16.gmra.mxu1 %vm683_vm1, %v2127_v28 }
  0x2d   : > { %752 = vmatprep.mubr.bf16.mxu0 %v2120_v27  ;;  %2073 = vmatprep.mubr.msk.bf16.mxu1 %vm683_vm1, %v2134_v29 }
  0x2e   : > { %974 = vrot.lane.b32.xlu0 %v2546_v49, %s2347_s27  ;;  %980 = vrot.lane.b32.xlu1 %v2560_v53, %s2347_s27 }
  0x32   : > { %978 = vrot.lane.b32.xlu0 %v2556_v51, %s2347_s27  ;;  %984 = vrot.lane.b32.xlu1 %v2571_v56, %s2347_s27 }
  0x34   : > { %753 = vmatmul.mubr.bf16.gmra.mxu0 %v2122_v30  ;;  %2074 = vmatmul.mubr.msk.bf16.gmra.mxu1 %vm683_vm1, %v2135_v36 }
  0x35   : > { %760 = vmatprep.mubr.bf16.mxu0 %v2123_v31  ;;  %2077 = vmatprep.mubr.msk.bf16.mxu1 %vm683_vm1, %v2142_v37 }
  0x36   : > { %982 = vrot.lane.b32.xlu0 %v2568_v55, %s2347_s27 }
  0x3c   : > { %761 = vmatmul.mubr.bf16.gmra.mxu0 %v2125_v39  ;;  %2078 = vmatmul.mubr.msk.bf16.gmra.mxu1 %vm683_vm1, %v2143_v44 }
  0x3d   : > { %768 = vmatprep.mubr.bf16.mxu0 %v2128_v41 }
  0x44   : > { %769 = vmatmul.mubr.bf16.gmra.mxu0 %v2130_v46 }
  0x45   : > { %776 = vmatprep.mubr.bf16.mxu0 %v2131_v48 }
  0x4c   : > { %777 = vmatmul.mubr.bf16.gmra.mxu0 %v2133_v52 }
  0x4d   : > { %784 = vmatprep.mubr.bf16.mxu0 %v2136_v54 }
  0x54   : > { %785 = vmatmul.mubr.bf16.gmra.mxu0 %v2138_v57 }
  0x55   : > { %792 = vmatprep.mubr.bf16.mxu0 %v2139_v58 }
  0x5c   : > { %793 = vmatmul.mubr.bf16.gmra.mxu0 %v2141_v59 }
  0x5d   : > { %800 = vmatprep.mubr.bf16.mxu0 %v2144_v60 }
  0x64   : > { %801 = vmatmul.mubr.bf16.gmra.mxu0 %v2146_v61 }
  0xe4   : > { %v2067_v62 = vpop.f32.mrf.mxu1 }
  0xe6   : > { %v843_v0 = vpop.f32.mrf.mxu1 }
  0xe8   : > { %v2068_v5 = vpop.f32.mrf.mxu1 }
  0xea   : > { %v846_v11 = vpop.f32.mrf.mxu1 }
  0xec   : > { %v1994_v63 = vpop.f32.mrf.mxu0  ;;  %v2071_v17 = vpop.f32.mrf.mxu1 }
  0xee   : > { %v1995_v1 = vpop.f32.mrf.mxu0  ;;  %v859_v23 = vpop.f32.mrf.mxu1 }
  0xef   : > { %v1996_v3 = vadd.f32 %v1995_v1, %v1994_v63 }
  0xf0   : > { %v1997_v4 = vpop.f32.mrf.mxu0  ;;  %v2072_v29 = vpop.f32.mrf.mxu1 }
  0xf1   : > { %v747_v6 = vadd.f32 %v1996_v3, %v2585_v2 }
  0xf2   : > { %v1998_v7 = vpop.f32.mrf.mxu0  ;;  %v862_v44 = vpop.f32.mrf.mxu1 }
  0xf3   : > { %v1999_v8 = vadd.f32 %v1998_v7, %v1997_v4  ;;  %v2588_v9 = vadd.f32 %v843_v0, %v747_v6 }
  0xf4   : > { %v2000_v10 = vpop.f32.mrf.mxu0  ;;  %v2075_v59 = vpop.f32.mrf.mxu1 }
  0xf5   : > { %2147 = vtanh.f32 %v2588_v9  ;;  %v750_v12 = vadd.f32 %v1999_v8, %v2585_v2 }
  0xf6   : > { %v2001_v13 = vpop.f32.mrf.mxu0  ;;  %v875_v3 = vpop.f32.mrf.mxu1 }
  0xf7   : > { %v2002_v14 = vadd.f32 %v2001_v13, %v2000_v10  ;;  %v2592_v15 = vadd.f32 %v846_v11, %v750_v12 }
  0xf8   : > { %v2003_v16 = vpop.f32.mrf.mxu0  ;;  %v2076_v11 = vpop.f32.mrf.mxu1 }
  0xf9   : > { %v755_v18 = vadd.f32 %v2002_v14, %v2585_v2  ;;  %2149 = vtanh.f32 %v2592_v15 }
  0xfa   : > { %v2004_v19 = vpop.f32.mrf.mxu0 }
  0xfb   : > { %v2596_v20 = vadd.f32 %v2067_v62, %v755_v18  ;;  %v2005_v21 = vadd.f32 %v2004_v19, %v2003_v16  ;;  %v878_v19 = vpop.f32.mrf.mxu1 }
  0xfc   : > { %v2006_v22 = vpop.f32.mrf.mxu0 }
  0xfd   : > { %2151 = vtanh.f32 %v2596_v20  ;;  %v758_v24 = vadd.f32 %v2005_v21, %v2585_v2 }
  0xfe   : > { %v2007_v25 = vpop.f32.mrf.mxu0 }
  0xff   : > { %v2600_v26 = vadd.f32 %v2068_v5, %v758_v24  ;;  %v2008_v27 = vadd.f32 %v2007_v25, %v2006_v22 }
 0x100   : > { %v2009_v28 = vpop.f32.mrf.mxu0 }
 0x101   : > { %2153 = vtanh.f32 %v2600_v26  ;;  %v763_v30 = vadd.f32 %v2008_v27, %v2585_v2 }
 0x102   : > { %v2148_v31 = vpop.eup %2147  ;;  %v2010_v36 = vpop.f32.mrf.mxu0 }
 0x103   : > { %v2011_v37 = vadd.f32 %v2010_v36, %v2009_v28  ;;  %v2604_v39 = vadd.f32 %v859_v23, %v763_v30  ;;  %1195 = vrot.lane.b32.xlu0 %v2148_v31, %s2348_s30  ;;  %v2079_v31 = vpop.f32.mrf.mxu1 }
 0x104   : > { %v2012_v41 = vpop.f32.mrf.mxu0 }
 0x105   : > { %2155 = vtanh.f32 %v2604_v39  ;;  %v766_v46 = vadd.f32 %v2011_v37, %v2585_v2 }
 0x106   : > { %v2150_v48 = vpop.eup %2149  ;;  %v2013_v52 = vpop.f32.mrf.mxu0 }
 0x107   : > { %v2014_v54 = vadd.f32 %v2013_v52, %v2012_v41  ;;  %v2609_v57 = vadd.f32 %v862_v44, %v766_v46  ;;  %1197 = vrot.lane.b32.xlu1 %v2150_v48, %s2348_s30  ;;  %v891_v52 = vpop.f32.mrf.mxu1 }
 0x108   : > { %v2015_v58 = vpop.f32.mrf.mxu0 }
 0x109   : > { %v771_v60 = vadd.f32 %v2014_v54, %v2585_v2  ;;  %2157 = vtanh.f32 %v2609_v57 }
 0x10a   : > { %v2152_v61 = vpop.eup %2151  ;;  %v2016_v62 = vpop.f32.mrf.mxu0 }
 0x10b   : > { %v2614_v63 = vadd.f32 %v2071_v17, %v771_v60  ;;  %v2017_v0 = vadd.f32 %v2016_v62, %v2015_v58  ;;  %1199 = vrot.lane.b32.xlu0 %v2152_v61, %s2348_s30 }
 0x10c   : > { %v2018_v1 = vpop.f32.mrf.mxu0 }
 0x10d   : > { %2159 = vtanh.f32 %v2614_v63  ;;  %v774_v4 = vadd.f32 %v2017_v0, %v2585_v2  ;;  %v2080_v0 = vpop.f32.mrf.mxu1 }
 0x10e   : > { %v2154_v5 = vpop.eup %2153  ;;  %v2019_v6 = vpop.f32.mrf.mxu0 }
 0x10f   : > { %v2619_v7 = vadd.f32 %v2072_v29, %v774_v4  ;;  %v2020_v8 = vadd.f32 %v2019_v6, %v2018_v1  ;;  %1201 = vrot.lane.b32.xlu1 %v2154_v5, %s2348_s30 }
 0x110   : > { %v2021_v10 = vpop.f32.mrf.mxu0 }
 0x111   : > { %3161 = vst [vmem:[#allocation2_spill] sm:$0xff] %v2619_v7  ;;  %2161 = vtanh.f32 %v2619_v7  ;;  %v779_v12 = vadd.f32 %v2020_v8, %v2585_v2  ;;  %v894_v8 = vpop.f32.mrf.mxu1 }
 0x112   : > { %v2156_v13 = vpop.eup %2155  ;;  %v2022_v14 = vpop.f32.mrf.mxu0 }
 0x113   : > { %v2023_v16 = vadd.f32 %v2022_v14, %v2021_v10  ;;  %v2624_v17 = vadd.f32 %v875_v3, %v779_v12  ;;  %1203 = vrot.lane.b32.xlu0 %v2156_v13, %s2348_s30 }
 0x114   : > { %v2024_v18 = vpop.f32.mrf.mxu0 }
 0x115   : > { %2163 = vtanh.f32 %v2624_v17  ;;  %v782_v21 = vadd.f32 %v2023_v16, %v2585_v2 }
 0x116   : > { %v2158_v22 = vpop.eup %2157  ;;  %v2025_v23 = vpop.f32.mrf.mxu0 }
 0x117   : > { %v2026_v24 = vadd.f32 %v2025_v23, %v2024_v18  ;;  %v2630_v25 = vadd.f32 %v878_v19, %v782_v21  ;;  %1205 = vrot.lane.b32.xlu1 %v2158_v22, %s2348_s30 }
 0x118   : > { %v2027_v27 = vpop.f32.mrf.mxu0 }
 0x119   : > { %3162 = vst [vmem:[#allocation3_spill] sm:$0xff] %v2630_v25  ;;  %v787_v28 = vadd.f32 %v2026_v24, %v2585_v2  ;;  %2165 = vtanh.f32 %v2630_v25 }
 0x11a   : > { %v2160_v29 = vpop.eup %2159  ;;  %v2028_v30 = vpop.f32.mrf.mxu0 }
 0x11b   : > { %v2636_v36 = vadd.f32 %v2075_v59, %v787_v28  ;;  %v2029_v37 = vadd.f32 %v2028_v30, %v2027_v27  ;;  %1207 = vrot.lane.b32.xlu0 %v2160_v29, %s2348_s30 }
 0x11c   : > { %v2030_v41 = vpop.f32.mrf.mxu0 }
 0x11d   : > { %3163 = vst [vmem:[#allocation4_spill] sm:$0xff] %v2636_v36  ;;  %2167 = vtanh.f32 %v2636_v36  ;;  %v790_v44 = vadd.f32 %v2029_v37, %v2585_v2  ;;  %v924_v37 = vld [vmem:[%s2671_s14 + $0x10] sm:$0xff] }
 0x11e   : > { %v2162_v46 = vpop.eup %2161  ;;  %v2031_v48 = vpop.f32.mrf.mxu0 }
 0x11f   : > { %v2642_v54 = vadd.f32 %v2076_v11, %v790_v44  ;;  %v2032_v58 = vadd.f32 %v2031_v48, %v2030_v41  ;;  %1209 = vrot.lane.b32.xlu1 %v2162_v46, %s2348_s30  ;;  %v923_v41 = vld [vmem:[%s2671_s14 + $0x8] sm:$0xff]  ;;  %v926_v48 = vld [vmem:[%s2671_s14 + $0x20] sm:$0xff] }
 0x120   : > { %v2033_v59 = vpop.f32.mrf.mxu0 }
 0x121   : > { %3164 = vst [vmem:[#allocation5_spill] sm:$0xff] %v2642_v54  ;;  %2169 = vtanh.f32 %v2642_v54  ;;  %v795_v60 = vadd.f32 %v2032_v58, %v2585_v2  ;;  %v2691_v58 = vpop.permute.xlu1 %958 }
 0x122   : > { %v2164_v61 = vpop.eup %2163  ;;  %v2034_v62 = vpop.f32.mrf.mxu0 }
 0x123   : > { %v2647_v1 = vadd.f32 %v891_v52, %v795_v60  ;;  %v2035_v3 = vadd.f32 %v2034_v62, %v2033_v59  ;;  %1211 = vrot.lane.b32.xlu0 %v2164_v61, %s2348_s30  ;;  %v925_v52 = vld [vmem:[%s2671_s14 + $0x18] sm:$0xff]  ;;  %v928_v61 = vld [vmem:[%s2671_s14 + $0x30] sm:$0xff]  ;;  %v927_v62 = vld [vmem:[%s2671_s14 + $0x28] sm:$0xff] }
 0x124   : > { %v2036_v4 = vpop.f32.mrf.mxu0 }
 0x125   : > { %3165 = vst [vmem:[#allocation6_spill] sm:$0xff] %v2647_v1  ;;  %2171 = vtanh.f32 %v2647_v1  ;;  %v798_v5 = vadd.f32 %v2035_v3, %v2585_v2  ;;  %v1005_v3 = vsel %vm1002_vm2, %v2491_v33, %v2691_v58  ;;  %v2718_v33 = vld [vmem:[%s2671_s14 + $0x50] sm:$0xff] }
 0x126   : > { %v2166_v6 = vpop.eup %2165  ;;  %v2037_v10 = vpop.f32.mrf.mxu0 }
 0x127   : > { %v2652_v11 = vadd.f32 %v894_v8, %v798_v5  ;;  %v2038_v12 = vadd.f32 %v2037_v10, %v2036_v4  ;;  %1213 = vrot.lane.b32.xlu1 %v2166_v6, %s2348_s30  ;;  %v2705_v4 = vpop.permute.xlu1 %960  ;;  %v930_v5 = vld [vmem:[%s2671_s14 + $0x40] sm:$0xff]  ;;  %v929_v6 = vld [vmem:[%s2671_s14 + $0x38] sm:$0xff]  ;;  %v1021_v10 = vmul.f32 %v1005_v3, %v924_v37 }
 0x128   : > { %v2039_v13 = vpop.f32.mrf.mxu0 }
 0x129   : > { %3166 = vst [vmem:[#allocation7_spill] sm:$0xff] %v2652_v11  ;;  %2173 = vtanh.f32 %v2652_v11  ;;  %v803_v14 = vadd.f32 %v2038_v12, %v2585_v2  ;;  %v1006_v12 = vsel %vm1002_vm2, %v2499_v35, %v2705_v4 }
 0x12a   : > { %v2168_v16 = vpop.eup %2167  ;;  %v2040_v18 = vpop.f32.mrf.mxu0 }
 0x12b   : > { %v2657_v19 = vadd.f32 %v2079_v31, %v803_v14  ;;  %v2041_v21 = vadd.f32 %v2040_v18, %v2039_v13  ;;  %1215 = vrot.lane.b32.xlu0 %v2168_v16, %s2348_s30  ;;  %v2676_v31 = vpop.permute.xlu0 %954  ;;  %v931_v14 = vld [vmem:[%s2671_s14 + $0x48] sm:$0xff]  ;;  %v2723_v16 = vpop.permute.xlu1 %964 }
 0x12c   : > { %v1003_v44 = vsel %vm1002_vm2, %v2485_v32, %v2676_v31 }
 0x12d   : > { %3167 = vst [vmem:[#allocation8_spill] sm:$0xff] %v2657_v19  ;;  %2175 = vtanh.f32 %v2657_v19  ;;  %v806_v22 = vadd.f32 %v2041_v21, %v2585_v2  ;;  %v922_v2 = vld [vmem:[%s2671_s14] sm:$0xff]  ;;  %v1037_v21 = vadd.f32 %v1021_v10, %v2596_v20 }
 0x12e   : > { %v2170_v23 = vpop.eup %2169  ;;  %v1019_v59 = vmul.f32 %v1003_v44, %v922_v2 }
 0x12f   : > { %v2662_v24 = vadd.f32 %v2080_v0, %v806_v22  ;;  %1217 = vrot.lane.b32.xlu1 %v2170_v23, %s2348_s30  ;;  %v2686_v46 = vpop.permute.xlu0 %956  ;;  %v1022_v22 = vmul.f32 %v1006_v12, %v925_v52  ;;  %v2731_v23 = vld [vmem:[%s2671_s14 + $0x60] sm:$0xff] }
 0x130   : > { %v1004_v60 = vsel %vm1002_vm2, %v2494_v34, %v2686_v46  ;;  %v1035_v32 = vadd.f32 %v1019_v59, %v2588_v9 }
 0x131   : > { %3168 = vst [vmem:[#allocation9_spill] sm:$0xff] %v2662_v24  ;;  %2177 = vtanh.f32 %v2662_v24  ;;  %v1020_v0 = vmul.f32 %v1004_v60, %v923_v41 }
 0x132   : > { %v2172_v27 = vpop.eup %2171  ;;  %v1944_v34 = vmul.f32 -1.442695, %v1035_v32 }
 0x133   : > { %1219 = vrot.lane.b32.xlu0 %v2172_v27, %s2348_s30  ;;  %v1036_v8 = vadd.f32 %v1020_v0, %v2592_v15  ;;  %v2715_v13 = vpop.permute.xlu0 %962  ;;  %v1008_v27 = vsel %vm1002_vm2, %v2512_v40, %v2723_v16 }
 0x134   : > { %2179 = vpow2.f32 %v1944_v34  ;;  %v1007_v35 = vsel %vm1002_vm2, %v2508_v38, %v2715_v13 }
 0x135   : > { %v1945_v18 = vmul.f32 -1.442695, %v1036_v8 }
 0x136   : > { %v2174_v28 = vpop.eup %2173 }
 0x137   : > { %1221 = vrot.lane.b32.xlu1 %v2174_v28, %s2348_s30  ;;  %v2737_v28 = vld [vmem:[%s2671_s14 + $0x58] sm:$0xff]  ;;  %2181 = vpow2.f32 %v1945_v18  ;;  %v2744_v38 = vpop.permute.xlu0 %966 }
 0x138   : > { %v1009_v40 = vsel %vm1002_vm2, %v2522_v42, %v2744_v38 }
 0x139   : > { %v1025_v60 = vmul.f32 %v1009_v40, %v928_v61 }
 0x13a   : > { %v2176_v29 = vpop.eup %2175 }
 0x13b   : > { %1223 = vrot.lane.b32.xlu0 %v2176_v29, %s2348_s30  ;;  %v1946_v29 = vmul.f32 -1.442695, %v1037_v21  ;;  %v2761_v42 = vpop.permute.xlu0 %970  ;;  %v1041_v34 = vadd.f32 %v1025_v60, %v2614_v63 }
 0x13c   : > { %v1011_v10 = vsel %vm1002_vm2, %v2533_v45, %v2761_v42 }
 0x13d   : > { %2183 = vpow2.f32 %v1946_v29 }
 0x13e   : > { %v2178_v30 = vpop.eup %2177 }
 0x13f   : > { %1355 = vrot.lane.b32.xlu0 %v922_v2, %s2349_s15  ;;  %1225 = vrot.lane.b32.xlu1 %v2178_v30, %s2348_s30  ;;  %v1038_v2 = vadd.f32 %v1022_v22, %v2600_v26  ;;  %v1023_v30 = vmul.f32 %v1007_v35, %v926_v48  ;;  %v1027_v22 = vmul.f32 %v1011_v10, %v930_v5  ;;  %v2773_v29 = vpop.permute.xlu0 %974 }
 0x141   : > { %v1947_v44 = vmul.f32 -1.442695, %v1038_v2  ;;  %v2180_v0 = vpop.eup %2179  ;;  %v1043_v2 = vadd.f32 %v1027_v22, %v2624_v17 }
 0x142   : > { %v1099_v12 = vadd.f32 1.0, %v2180_v0 }
 0x143   : > { %1359 = vrot.lane.b32.xlu0 %v924_v37, %s2349_s15  ;;  %1357 = vrot.lane.b32.xlu1 %v923_v41, %s2349_s15  ;;  %v1024_v37 = vmul.f32 %v1008_v27, %v927_v62  ;;  %v2747_v41 = vld [vmem:[%s2671_s14 + $0x68] sm:$0xff]  ;;  %2185 = vpow2.f32 %v1947_v44 }
 0x145   : > { %v1040_v59 = vadd.f32 %v1024_v37, %v2609_v57 }
 0x147   : > { %1363 = vrot.lane.b32.xlu0 %v926_v48, %s2349_s15  ;;  %1361 = vrot.lane.b32.xlu1 %v925_v52, %s2349_s15  ;;  %v1039_v52 = vadd.f32 %v1023_v30, %v2604_v39  ;;  %v2755_v48 = vpop.permute.xlu1 %968  ;;  %v1949_v3 = vmul.f32 -1.442695, %v1040_v59 }
 0x149   : > { %v1948_v32 = vmul.f32 -1.442695, %v1039_v52  ;;  %v1952_v52 = vmul.f32 -1.442695, %v1043_v2 }
 0x14b   : > { %1367 = vrot.lane.b32.xlu0 %v928_v61, %s2349_s15  ;;  %1365 = vrot.lane.b32.xlu1 %v927_v62, %s2349_s15  ;;  %v1010_v62 = vsel %vm1002_vm2, %v2525_v43, %v2755_v48  ;;  %2187 = vpow2.f32 %v1948_v32  ;;  %v2182_v61 = vpop.eup %2181  ;;  %v2767_v18 = vpop.permute.xlu1 %972  ;;  %v1950_v43 = vmul.f32 -1.442695, %v1041_v34 }
 0x14c   : > { %v1026_v8 = vmul.f32 %v1010_v62, %v929_v6  ;;  %2189 = vpow2.f32 %v1949_v3  ;;  %v1012_v35 = vsel %vm1002_vm2, %v2537_v47, %v2767_v18  ;;  %v2184_v27 = vpop.eup %2183  ;;  %v2781_v47 = vpop.permute.xlu0 %978 }
 0x14d   : > { %2191 = vrcp.f32 %v1099_v12  ;;  %v1028_v30 = vmul.f32 %v1012_v35, %v931_v14  ;;  %v1101_v37 = vadd.f32 1.0, %v2184_v27 }
 0x14e   : > { %v1042_v21 = vadd.f32 %v1026_v8, %v2619_v7  ;;  %2193 = vpow2.f32 %v1950_v43 }
 0x14f   : > { %1371 = vrot.lane.b32.xlu0 %v930_v5, %s2349_s15  ;;  %1369 = vrot.lane.b32.xlu1 %v929_v6, %s2349_s15  ;;  %v1100_v6 = vadd.f32 1.0, %v2182_v61  ;;  %v1013_v5 = vsel %vm1002_vm2, %v2546_v49, %v2773_v29  ;;  %v2779_v44 = vpop.permute.xlu1 %976  ;;  %v1044_v59 = vadd.f32 %v1028_v30, %v2630_v25 }
 0x150   : > { %v1951_v45 = vmul.f32 -1.442695, %v1042_v21  ;;  %v2186_v40 = vpop.eup %2185  ;;  %v1029_v62 = vmul.f32 %v1013_v5, %v2718_v33  ;;  %v1014_v32 = vsel %vm1002_vm2, %v2549_v50, %v2779_v44  ;;  %v2790_v49 = vpop.permute.xlu0 %982 }
 0x151   : > { %2195 = vrcp.f32 %v1100_v6  ;;  %v1102_v60 = vadd.f32 1.0, %v2186_v40  ;;  %v1953_v3 = vmul.f32 -1.442695, %v1044_v59  ;;  %v1030_v12 = vmul.f32 %v1014_v32, %v2737_v28 }
 0x152   : > { %2197 = vpow2.f32 %v1951_v45  ;;  %v1045_v10 = vadd.f32 %v1029_v62, %v2636_v36 }
 0x153   : > { %1375 = vrot.lane.b32.xlu0 %v2718_v33, %s2349_s15  ;;  %1373 = vrot.lane.b32.xlu1 %v931_v14, %s2349_s15  ;;  %2199 = vrcp.f32 %v1101_v37  ;;  %v2788_v0 = vpop.permute.xlu1 %980  ;;  %v1015_v33 = vsel %vm1002_vm2, %v2556_v51, %v2781_v47  ;;  %v1046_v27 = vadd.f32 %v1030_v12, %v2642_v54 }
 0x154   : > { %2201 = vpow2.f32 %v1952_v52  ;;  %v1954_v6 = vmul.f32 -1.442695, %v1045_v10  ;;  %v1016_v51 = vsel %vm1002_vm2, %v2560_v53, %v2788_v0  ;;  %v1017_v53 = vsel %vm1002_vm2, %v2568_v55, %v2790_v49 }
 0x155   : > { %2203 = vrcp.f32 %v1102_v60  ;;  %v1955_v5 = vmul.f32 -1.442695, %v1046_v27  ;;  %v2817_v60 = vld [vmem:[%s2671_s14 + $0x70] sm:$0xff] }
 0x156   : > { %2205 = vpow2.f32 %v1953_v3 }
 0x157   : > { %1379 = vrot.lane.b32.xlu0 %v2731_v23, %s2349_s15  ;;  %1377 = vrot.lane.b32.xlu1 %v2737_v28, %s2349_s15  ;;  %v2799_v50 = vpop.permute.xlu1 %984  ;;  %v1031_v28 = vmul.f32 %v1015_v33, %v2731_v23  ;;  %v1032_v23 = vmul.f32 %v1016_v51, %v2747_v41  ;;  %v2829_v33 = vld [vmem:[%s2671_s14 + $0x78] sm:$0xff] }
 0x158   : > { %v2188_v14 = vpop.eup %2187  ;;  %v1018_v55 = vsel %vm1002_vm2, %v2571_v56, %v2799_v50 }
 0x159   : > { %v2190_v34 = vpop.eup %2189  ;;  %v1103_v8 = vadd.f32 1.0, %v2188_v14  ;;  %v1047_v52 = vadd.f32 %v1031_v28, %v2647_v1  ;;  %v1034_v28 = vmul.f32 %v1018_v55, %v2829_v33 }
 0x15a   : > { %v2794_v61 = vpop.eup %2191  ;;  %v1104_v22 = vadd.f32 1.0, %v2190_v34  ;;  %v1033_v34 = vmul.f32 %v1017_v53, %v2817_v60 }
 0x15b   : > { %1381 = vrot.lane.b32.xlu1 %v2747_v41, %s2349_s15  ;;  %v2194_v35 = vpop.eup %2193  ;;  %2207 = vrcp.f32 %v1103_v8  ;;  %v1956_v41 = vmul.f32 -1.442695, %v1047_v52  ;;  %v1048_v8 = vadd.f32 %v1032_v23, %v2652_v11 }
 0x15c   : > { %2209 = vrcp.f32 %v1104_v22  ;;  %v1105_v37 = vadd.f32 1.0, %v2194_v35  ;;  %v1049_v35 = vadd.f32 %v1033_v34, %v2657_v19 }
 0x15d   : > { %2211 = vpow2.f32 %v1954_v6  ;;  %v1957_v6 = vmul.f32 -1.442695, %v1048_v8 }
 0x15e   : > { %v2805_v45 = vpop.eup %2195  ;;  %2213 = vrcp.f32 %v1105_v37  ;;  %v1958_v37 = vmul.f32 -1.442695, %v1049_v35 }
 0x15f   : > { %v2198_v40 = vpop.eup %2197  ;;  %2215 = vpow2.f32 %v1955_v5  ;;  %v1050_v5 = vadd.f32 %v1034_v28, %v2662_v24  ;;  %v1148_v19 = vmul.f32 %v2805_v45, %v2686_v46 }
 0x160   : > { %v2814_v59 = vpop.eup %2199  ;;  %v1106_v32 = vadd.f32 1.0, %v2198_v40 }
 0x161   : > { %v2202_v3 = vpop.eup %2201  ;;  %v1149_v25 = vmul.f32 %v2814_v59, %v2691_v58 }
 0x162   : > { %v2826_v10 = vpop.eup %2203  ;;  %2217 = vrcp.f32 %v1106_v32  ;;  %v1959_v32 = vmul.f32 -1.442695, %v1050_v5 }
 0x163   : > { %v2206_v22 = vpop.eup %2205  ;;  %2219 = vpow2.f32 %v1956_v41  ;;  %v1150_v46 = vmul.f32 %v2826_v10, %v2705_v4 }
 0x164   : > { %v1108_v56 = vadd.f32 1.0, %v2206_v22 }
 0x168   : > { %v2837_v27 = vpop.eup %2207 }
 0x175   : > { %v1196_v43 = vpop.permute.xlu0 %1195 }
 0x176   : > { %v1243_v21 = vmul.f32 %v2794_v61, %v1196_v43 }
 0x178   : > { %1275 = vrot.lane.b32.xlu0 %v1243_v21, %s2347_s27  ;;  %v1107_v21 = vadd.f32 1.0, %v2202_v3 }
 0x179   : > { %v1198_v2 = vpop.permute.xlu1 %1197 }
 0x17a   : > { %v1244_v30 = vmul.f32 %v2805_v45, %v1198_v2  ;;  %2221 = vrcp.f32 %v1107_v21 }
 0x17b   : > { %2223 = vpow2.f32 %v1957_v6 }
 0x17c   : > { %1277 = vrot.lane.b32.xlu1 %v1244_v30, %s2347_s27  ;;  %v2841_v30 = vpop.eup %2209  ;;  %2225 = vrcp.f32 %v1108_v56 }
 0x17d   : > { %v1200_v62 = vpop.permute.xlu0 %1199  ;;  %v2212_v40 = vpop.eup %2211  ;;  %2227 = vpow2.f32 %v1958_v37 }
 0x17e   : > { %v1245_v14 = vmul.f32 %v2814_v59, %v1200_v62  ;;  %v2846_v53 = vpop.eup %2213  ;;  %v1109_v62 = vadd.f32 1.0, %v2212_v40 }
 0x180   : > { %1279 = vrot.lane.b32.xlu0 %v1245_v14, %s2347_s27  ;;  %v2216_v14 = vpop.eup %2215  ;;  %2229 = vrcp.f32 %v1109_v62 }
 0x181   : > { %v1202_v12 = vpop.permute.xlu1 %1201  ;;  %v2850_v41 = vpop.eup %2217  ;;  %v1110_v8 = vadd.f32 1.0, %v2216_v14  ;;  %2231 = vpow2.f32 %v1959_v32 }
 0x182   : > { %v1246_v43 = vmul.f32 %v2826_v10, %v1202_v12  ;;  %v2220_v12 = vpop.eup %2219 }
 0x183   : > { %2233 = vrcp.f32 %v1110_v8  ;;  %v1111_v22 = vadd.f32 1.0, %v2220_v12 }
 0x184   : > { %1281 = vrot.lane.b32.xlu1 %v1246_v43, %s2347_s27 }
 0x185   : > { %v1204_v51 = vpop.permute.xlu0 %1203  ;;  %2235 = vrcp.f32 %v1111_v22 }
 0x186   : > { %v1247_v2 = vmul.f32 %v2837_v27, %v1204_v51 }
 0x187   : > { %v2854_v21 = vpop.eup %2221 }
 0x188   : > { %1283 = vrot.lane.b32.xlu0 %v1247_v2, %s2347_s27  ;;  %v2224_v35 = vpop.eup %2223 }
 0x189   : > { %v1206_v52 = vpop.permute.xlu1 %1205  ;;  %v2858_v51 = vpop.eup %2225  ;;  %v1112_v2 = vadd.f32 1.0, %v2224_v35 }
 0x18a   : > { %v1248_v23 = vmul.f32 %v2841_v30, %v1206_v52  ;;  %v2228_v56 = vpop.eup %2227 }
 0x18b   : > { %v1113_v5 = vadd.f32 1.0, %v2228_v56  ;;  %2237 = vrcp.f32 %v1112_v2 }
 0x18c   : > { %1285 = vrot.lane.b32.xlu1 %v1248_v23, %s2347_s27 }
 0x18d   : > { %v1208_v3 = vpop.permute.xlu0 %1207  ;;  %v2863_v52 = vpop.eup %2229  ;;  %2239 = vrcp.f32 %v1113_v5 }
 0x18e   : > { %v1249_v34 = vmul.f32 %v2846_v53, %v1208_v3  ;;  %v2232_v62 = vpop.eup %2231 }
 0x18f   : > { %v1114_v3 = vadd.f32 1.0, %v2232_v62 }
 0x190   : > { %1287 = vrot.lane.b32.xlu0 %v1249_v34, %s2347_s27  ;;  %v2867_v32 = vpop.eup %2233 }
 0x191   : > { %v1210_v55 = vpop.permute.xlu1 %1209  ;;  %2241 = vrcp.f32 %v1114_v3 }
 0x192   : > { %v1250_v43 = vmul.f32 %v2850_v41, %v1210_v55  ;;  %v2871_v12 = vpop.eup %2235 }
 0x194   : > { %1289 = vrot.lane.b32.xlu1 %v1250_v43, %s2347_s27 }
 0x195   : > { %v1212_v6 = vpop.permute.xlu0 %1211 }
 0x196   : > { %v1251_v28 = vmul.f32 %v2854_v21, %v1212_v6 }
 0x198   : > { %1291 = vrot.lane.b32.xlu0 %v1251_v28, %s2347_s27  ;;  %v2875_v22 = vpop.eup %2237 }
 0x199   : > { %v1214_v37 = vpop.permute.xlu1 %1213 }
 0x19a   : > { %v1252_v40 = vmul.f32 %v2858_v51, %v1214_v37  ;;  %v2879_v28 = vpop.eup %2239 }
 0x19c   : > { %1293 = vrot.lane.b32.xlu1 %v1252_v40, %s2347_s27 }
 0x19d   : > { %v1216_v23 = vpop.permute.xlu0 %1215 }
 0x19e   : > { %v1253_v14 = vmul.f32 %v2863_v52, %v1216_v23  ;;  %v2883_v37 = vpop.eup %2241 }
 0x1a0   : > { %1295 = vrot.lane.b32.xlu0 %v1253_v14, %s2347_s27 }
 0x1a1   : > { %v1218_v34 = vpop.permute.xlu1 %1217 }
 0x1a2   : > { %v1254_v8 = vmul.f32 %v2867_v32, %v1218_v34 }
 0x1a4   : > { %1297 = vrot.lane.b32.xlu1 %v1254_v8, %s2347_s27 }
 0x1a5   : > { %v1220_v55 = vpop.permute.xlu0 %1219 }
 0x1a6   : > { %v1255_v43 = vmul.f32 %v2871_v12, %v1220_v55 }
 0x1a8   : > { %1299 = vrot.lane.b32.xlu0 %v1255_v43, %s2347_s27 }
 0x1a9   : > { %v1222_v35 = vpop.permute.xlu1 %1221 }
 0x1aa   : > { %v1256_v6 = vmul.f32 %v2875_v22, %v1222_v35 }
 0x1ac   : > { %1301 = vrot.lane.b32.xlu1 %v1256_v6, %s2347_s27 }
 0x1ad   : > { %v1224_v2 = vpop.permute.xlu0 %1223 }
 0x1ae   : > { %v1257_v56 = vmul.f32 %v2879_v28, %v1224_v2 }
 0x1b0   : > { %1303 = vrot.lane.b32.xlu0 %v1257_v56, %s2347_s27 }
 0x1b1   : > { %v1226_v40 = vpop.permute.xlu1 %1225  ;;  %v1356_v23 = vpop.permute.xlu0 %1355 }
 0x1b2   : > { %v1258_v5 = vmul.f32 %v2883_v37, %v1226_v40 }
 0x1b4   : > { %1383 = vrot.lane.b32.xlu0 %v2817_v60, %s2349_s15  ;;  %1305 = vrot.lane.b32.xlu1 %v1258_v5, %s2347_s27  ;;  %v1147_v5 = vmul.f32 %v2794_v61, %v2676_v31 }
 0x1b5   : > { %v1358_v62 = vpop.permute.xlu1 %1357  ;;  %v1360_v14 = vpop.permute.xlu0 %1359 }
 0x1b8   : > { %1385 = vrot.lane.b32.xlu1 %v2829_v33, %s2349_s15 }
 0x1b9   : > { %v1362_v3 = vpop.permute.xlu1 %1361  ;;  %v1364_v34 = vpop.permute.xlu0 %1363 }
 0x1bd   : > { %v1366_v8 = vpop.permute.xlu1 %1365  ;;  %v1368_v55 = vpop.permute.xlu0 %1367 }
 0x1c1   : > { %v1370_v43 = vpop.permute.xlu1 %1369  ;;  %v1372_v35 = vpop.permute.xlu0 %1371 }
 0x1c5   : > { %v1374_v6 = vpop.permute.xlu1 %1373  ;;  %v1376_v2 = vpop.permute.xlu0 %1375 }
 0x1c9   : > { %v1378_v56 = vpop.permute.xlu1 %1377  ;;  %v2891_v40 = vpop.permute.xlu0 %1379 }
 0x1cd   : > { %v2893_v60 = vpop.permute.xlu1 %1381 }
 0x1ea   : > { %v1276_v33 = vpop.permute.xlu0 %1275 }
 0x1eb   : > { %v2897_v24 = vadd.f32 %v1276_v33, %v1147_v5 }
 0x1ed   : > { %v1403_v11 = vmul.f32 %v1356_v23, %v2897_v24  ;;  %2243 = vtanh.f32 %v2897_v24 }
 0x1ee   : > { %v1278_v1 = vpop.permute.xlu1 %1277 }
 0x1ef   : > { %v2902_v54 = vadd.f32 %v1278_v1, %v1148_v19  ;;  %1435 = vrot.lane.b32.xlu0 %v1403_v11, %s2348_s30  ;;  %v1151_v11 = vmul.f32 %v2837_v27, %v2715_v13  ;;  %v1153_v13 = vmul.f32 %v2846_v53, %v2744_v38  ;;  %v1155_v38 = vmul.f32 %v2854_v21, %v2761_v42 }
 0x1f0   : > { %v1157_v42 = vmul.f32 %v2863_v52, %v2773_v29  ;;  %v1159_v29 = vmul.f32 %v2871_v12, %v2781_v47 }
 0x1f1   : > { %v1404_v36 = vmul.f32 %v1358_v62, %v2902_v54 }
 0x1f2   : > { %v1280_v7 = vpop.permute.xlu0 %1279 }
 0x1f3   : > { %v2908_v31 = vadd.f32 %v1280_v7, %v1149_v25  ;;  %1437 = vrot.lane.b32.xlu1 %v1404_v36, %s2348_s30  ;;  %v1152_v25 = vmul.f32 %v2841_v30, %v2723_v16  ;;  %v1154_v16 = vmul.f32 %v2850_v41, %v2755_v48  ;;  %v1156_v48 = vmul.f32 %v2858_v51, %v2767_v18 }
 0x1f4   : > { %v1158_v18 = vmul.f32 %v2867_v32, %v2779_v44  ;;  %v1160_v44 = vmul.f32 %v2875_v22, %v2788_v0 }
 0x1f5   : > { %v1405_v61 = vmul.f32 %v1360_v14, %v2908_v31  ;;  %2245 = vtanh.f32 %v2908_v31 }
 0x1f6   : > { %v1282_v45 = vpop.permute.xlu1 %1281  ;;  %2247 = vtanh.f32 %v2902_v54 }
 0x1f7   : > { %v2914_v1 = vadd.f32 %v1282_v45, %v1150_v46  ;;  %1439 = vrot.lane.b32.xlu0 %v1405_v61, %s2348_s30 }
 0x1f9   : > { %v1406_v19 = vmul.f32 %v1362_v3, %v2914_v1 }
 0x1fa   : > { %v1284_v58 = vpop.permute.xlu0 %1283 }
 0x1fb   : > { %v2920_v7 = vadd.f32 %v1284_v58, %v1151_v11  ;;  %1441 = vrot.lane.b32.xlu1 %v1406_v19, %s2348_s30  ;;  %v2244_v11 = vpop.eup %2243 }
 0x1fd   : > { %v1407_v36 = vmul.f32 %v1364_v34, %v2920_v7  ;;  %2249 = vtanh.f32 %v2920_v7 }
 0x1fe   : > { %v1286_v4 = vpop.permute.xlu1 %1285  ;;  %2251 = vtanh.f32 %v2914_v1 }
 0x1ff   : > { %v2926_v59 = vadd.f32 %v1286_v4, %v1152_v25  ;;  %1443 = vrot.lane.b32.xlu0 %v1407_v36, %s2348_s30 }
 0x201   : > { %v1408_v10 = vmul.f32 %v1366_v8, %v2926_v59 }
 0x202   : > { %v1288_v27 = vpop.permute.xlu0 %1287 }
 0x203   : > { %v2932_v23 = vadd.f32 %v1288_v27, %v1153_v13  ;;  %1445 = vrot.lane.b32.xlu1 %v1408_v10, %s2348_s30 }
 0x205   : > { %v1409_v30 = vmul.f32 %v1368_v55, %v2932_v23  ;;  %2253 = vtanh.f32 %v2932_v23 }
 0x206   : > { %v1290_v62 = vpop.permute.xlu1 %1289  ;;  %2255 = vtanh.f32 %v2926_v59 }
 0x207   : > { %v2938_v14 = vadd.f32 %v1290_v62, %v1154_v16  ;;  %1447 = vrot.lane.b32.xlu0 %v1409_v30, %s2348_s30 }
 0x209   : > { %v1410_v53 = vmul.f32 %v1370_v43, %v2938_v14 }
 0x20a   : > { %v1292_v3 = vpop.permute.xlu0 %1291 }
 0x20b   : > { %v2944_v34 = vadd.f32 %v1292_v3, %v1155_v38  ;;  %1449 = vrot.lane.b32.xlu1 %v1410_v53, %s2348_s30 }
 0x20d   : > { %v1411_v41 = vmul.f32 %v1372_v35, %v2944_v34  ;;  %2257 = vtanh.f32 %v2944_v34 }
 0x20e   : > { %v1294_v8 = vpop.permute.xlu1 %1293  ;;  %2259 = vtanh.f32 %v2938_v14 }
 0x20f   : > { %v2950_v55 = vadd.f32 %v1294_v8, %v1156_v48  ;;  %1451 = vrot.lane.b32.xlu0 %v1411_v41, %s2348_s30 }
 0x211   : > { %v1412_v21 = vmul.f32 %v1374_v6, %v2950_v55 }
 0x212   : > { %v1296_v43 = vpop.permute.xlu0 %1295 }
 0x213   : > { %v2956_v5 = vadd.f32 %v1296_v43, %v1157_v42  ;;  %1453 = vrot.lane.b32.xlu1 %v1412_v21, %s2348_s30 }
 0x215   : > { %v1413_v51 = vmul.f32 %v1376_v2, %v2956_v5  ;;  %2261 = vtanh.f32 %v2956_v5 }
 0x216   : > { %v1298_v35 = vpop.permute.xlu1 %1297  ;;  %2263 = vtanh.f32 %v2950_v55 }
 0x217   : > { %v2962_v33 = vadd.f32 %v1298_v35, %v1158_v18  ;;  %1455 = vrot.lane.b32.xlu0 %v1413_v51, %s2348_s30 }
 0x219   : > { %v1414_v52 = vmul.f32 %v1378_v56, %v2962_v33  ;;  %v1161_v56 = vmul.f32 %v2879_v28, %v2790_v49 }
 0x21a   : > { %v1300_v6 = vpop.permute.xlu0 %1299 }
 0x21b   : > { %v2968_v46 = vadd.f32 %v1300_v6, %v1159_v29  ;;  %1457 = vrot.lane.b32.xlu1 %v1414_v52, %s2348_s30 }
 0x21d   : > { %v1415_v32 = vmul.f32 %v2891_v40, %v2968_v46  ;;  %2265 = vtanh.f32 %v2968_v46 }
 0x21e   : > { %v1302_v2 = vpop.permute.xlu1 %1301  ;;  %2267 = vtanh.f32 %v2962_v33 }
 0x21f   : > { %v2976_v61 = vadd.f32 %v1302_v2, %v1160_v44  ;;  %1459 = vrot.lane.b32.xlu0 %v1415_v32, %s2348_s30 }
 0x221   : > { %v1416_v47 = vmul.f32 %v2893_v60, %v2976_v61  ;;  %v1162_v60 = vmul.f32 %v2883_v37, %v2799_v50  ;;  %v2246_v50 = vpop.eup %2245 }
 0x222   : > { %v1304_v12 = vpop.permute.xlu0 %1303  ;;  %v2248_v37 = vpop.eup %2247 }
 0x223   : > { %1461 = vrot.lane.b32.xlu1 %v1416_v47, %s2348_s30  ;;  %v2986_v0 = vadd.f32 %v1304_v12, %v1161_v56  ;;  %v2250_v58 = vpop.eup %2249 }
 0x224   : > { %v2252_v25 = vpop.eup %2251 }
 0x225   : > { %v2254_v36 = vpop.eup %2253  ;;  %2269 = vtanh.f32 %v2986_v0 }
 0x226   : > { %v1384_v22 = vpop.permute.xlu0 %1383  ;;  %v1306_v40 = vpop.permute.xlu1 %1305  ;;  %2271 = vtanh.f32 %v2976_v61 }
 0x227   : > { %v1417_v45 = vmul.f32 %v1384_v22, %v2986_v0  ;;  %v2994_v49 = vadd.f32 %v1306_v40, %v1162_v60  ;;  %v2256_v4 = vpop.eup %2255 }
 0x228   : > { %v2258_v13 = vpop.eup %2257 }
 0x229   : > { %1463 = vrot.lane.b32.xlu0 %v1417_v45, %s2348_s30  ;;  %v2260_v10 = vpop.eup %2259  ;;  %2273 = vtanh.f32 %v2994_v49  ;;  %v3169_v45 = vld [vmem:[#allocation2_spill] sm:$0xff] }
 0x22a   : > { %v1386_v28 = vpop.permute.xlu1 %1385  ;;  %v2262_v27 = vpop.eup %2261 }
 0x22b   : > { %v1418_v19 = vmul.f32 %v1386_v28, %v2994_v49  ;;  %v2264_v16 = vpop.eup %2263 }
 0x22c   : > { %v2266_v30 = vpop.eup %2265 }
 0x22d   : > { %1627 = vrot.lane.b32.xlu0 %v2244_v11, %s2348_s30  ;;  %1465 = vrot.lane.b32.xlu1 %v1418_v19, %s2348_s30  ;;  %v2268_v62 = vpop.eup %2267 }
 0x231   : > { %1631 = vrot.lane.b32.xlu0 %v2246_v50, %s2348_s30  ;;  %1629 = vrot.lane.b32.xlu1 %v2248_v37, %s2348_s30  ;;  %v3170_v50 = vld [vmem:[#allocation4_spill] sm:$0xff] }
 0x232   : > { %v2270_v38 = vpop.eup %2269 }
 0x233   : > { %v2272_v53 = vpop.eup %2271 }
 0x235   : > { %1635 = vrot.lane.b32.xlu0 %v2250_v58, %s2348_s30  ;;  %1633 = vrot.lane.b32.xlu1 %v2252_v25, %s2348_s30 }
 0x236   : > { %v2274_v3 = vpop.eup %2273 }
 0x239   : > { %1639 = vrot.lane.b32.xlu0 %v2254_v36, %s2348_s30  ;;  %1637 = vrot.lane.b32.xlu1 %v2256_v4, %s2348_s30 }
 0x23d   : > { %1643 = vrot.lane.b32.xlu0 %v2258_v13, %s2348_s30  ;;  %1641 = vrot.lane.b32.xlu1 %v2260_v10, %s2348_s30  ;;  %v3172_v10 = vld [vmem:[#allocation5_spill] sm:$0xff] }
 0x241   : > { %1647 = vrot.lane.b32.xlu0 %v2262_v27, %s2348_s30  ;;  %1645 = vrot.lane.b32.xlu1 %v2264_v16, %s2348_s30 }
 0x245   : > { %1651 = vrot.lane.b32.xlu0 %v2266_v30, %s2348_s30  ;;  %1649 = vrot.lane.b32.xlu1 %v2268_v62, %s2348_s30 }
 0x249   : > { %1655 = vrot.lane.b32.xlu0 %v2270_v38, %s2348_s30  ;;  %1653 = vrot.lane.b32.xlu1 %v2272_v53, %s2348_s30 }
 0x24d   : > { %1657 = vrot.lane.b32.xlu1 %v2274_v3, %s2348_s30 }
 0x261   : > { %v1436_v48 = vpop.permute.xlu0 %1435 }
 0x262   : > { %v1483_v41 = vadd.f32 %v1436_v48, %v2588_v9  ;;  %v3173_v48 = vld [vmem:[#allocation6_spill] sm:$0xff] }
 0x264   : > { %v1960_v43 = vmul.f32 -1.442695, %v1483_v41 }
 0x265   : > { %v1438_v8 = vpop.permute.xlu1 %1437 }
 0x266   : > { %v1484_v21 = vadd.f32 %v1438_v8, %v2592_v15  ;;  %2275 = vpow2.f32 %v1960_v43 }
 0x268   : > { %v1961_v29 = vmul.f32 -1.442695, %v1484_v21 }
 0x269   : > { %v1440_v42 = vpop.permute.xlu0 %1439 }
 0x26a   : > { %v1485_v18 = vadd.f32 %v1440_v42, %v2596_v20  ;;  %2277 = vpow2.f32 %v1961_v29 }
 0x26c   : > { %v1962_v52 = vmul.f32 -1.442695, %v1485_v18 }
 0x26d   : > { %v1442_v51 = vpop.permute.xlu1 %1441 }
 0x26e   : > { %v1486_v6 = vadd.f32 %v1442_v51, %v2600_v26  ;;  %2279 = vpow2.f32 %v1962_v52  ;;  %v3174_v51 = vld [vmem:[#allocation7_spill] sm:$0xff] }
 0x270   : > { %v1963_v9 = vmul.f32 -1.442695, %v1486_v6 }
 0x271   : > { %v1444_v35 = vpop.permute.xlu0 %1443 }
 0x272   : > { %v1487_v44 = vadd.f32 %v1444_v35, %v2604_v39  ;;  %2281 = vpow2.f32 %v1963_v9 }
 0x273   : > { %v2276_v11 = vpop.eup %2275 }
 0x274   : > { %v1964_v47 = vmul.f32 -1.442695, %v1487_v44  ;;  %v1547_v36 = vadd.f32 1.0, %v2276_v11 }
 0x275   : > { %v1446_v2 = vpop.permute.xlu1 %1445 }
 0x276   : > { %v1488_v12 = vadd.f32 %v1446_v2, %v2609_v57  ;;  %2283 = vpow2.f32 %v1964_v47  ;;  %v3171_v57 = vld [vmem:[#allocation3_spill] sm:$0xff] }
 0x277   : > { %v2278_v25 = vpop.eup %2277 }
 0x278   : > { %v1965_v26 = vmul.f32 -1.442695, %v1488_v12  ;;  %v1548_v30 = vadd.f32 1.0, %v2278_v25 }
 0x279   : > { %v1448_v32 = vpop.permute.xlu0 %1447 }
 0x27a   : > { %v1489_v15 = vadd.f32 %v1448_v32, %v2614_v63 }
 0x27b   : > { %v2280_v13 = vpop.eup %2279 }
 0x27c   : > { %v1966_v22 = vmul.f32 -1.442695, %v1489_v15  ;;  %v1549_v62 = vadd.f32 1.0, %v2280_v13  ;;  %v3175_v15 = vld [vmem:[#allocation8_spill] sm:$0xff] }
 0x27d   : > { %v1450_v56 = vpop.permute.xlu1 %1449 }
 0x27e   : > { %v1490_v39 = vadd.f32 %v1450_v56, %v3169_v45  ;;  %2285 = vpow2.f32 %v1966_v22 }
 0x27f   : > { %2287 = vpow2.f32 %v1965_v26  ;;  %v2282_v53 = vpop.eup %2281 }
 0x280   : > { %v1967_v63 = vmul.f32 -1.442695, %v1490_v39  ;;  %v1550_v21 = vadd.f32 1.0, %v2282_v53 }
 0x281   : > { %v1452_v20 = vpop.permute.xlu0 %1451 }
 0x282   : > { %v1491_v40 = vadd.f32 %v1452_v20, %v2624_v17 }
 0x283   : > { %v2284_v8 = vpop.eup %2283 }
 0x284   : > { %v1968_v19 = vmul.f32 -1.442695, %v1491_v40  ;;  %v1551_v18 = vadd.f32 1.0, %v2284_v8 }
 0x285   : > { %v1454_v60 = vpop.permute.xlu1 %1453 }
 0x286   : > { %v1492_v58 = vadd.f32 %v1454_v60, %v3171_v57  ;;  %2289 = vpow2.f32 %v1968_v19  ;;  %v3176_v19 = vld [vmem:[#allocation9_spill] sm:$0xff] }
 0x287   : > { %2291 = vpow2.f32 %v1967_v63 }
 0x288   : > { %v1969_v16 = vmul.f32 -1.442695, %v1492_v58  ;;  %2293 = vrcp.f32 %v1547_v36 }
 0x289   : > { %v1456_v28 = vpop.permute.xlu0 %1455 }
 0x28a   : > { %v1493_v37 = vadd.f32 %v1456_v28, %v3170_v50 }
 0x28b   : > { %v2286_v29 = vpop.eup %2285 }
 0x28c   : > { %v1970_v17 = vmul.f32 -1.442695, %v1493_v37  ;;  %v2288_v52 = vpop.eup %2287  ;;  %v1553_v44 = vadd.f32 1.0, %v2286_v29 }
 0x28d   : > { %v1458_v4 = vpop.permute.xlu1 %1457  ;;  %v1552_v2 = vadd.f32 1.0, %v2288_v52 }
 0x28e   : > { %v1494_v27 = vadd.f32 %v1458_v4, %v3172_v10  ;;  %2295 = vpow2.f32 %v1970_v17 }
 0x28f   : > { %2297 = vpow2.f32 %v1969_v16 }
 0x290   : > { %v1971_v3 = vmul.f32 -1.442695, %v1494_v27  ;;  %2299 = vrcp.f32 %v1548_v30 }
 0x291   : > { %v1460_v38 = vpop.permute.xlu0 %1459  ;;  %2301 = vrcp.f32 %v1549_v62 }
 0x292   : > { %v1495_v41 = vadd.f32 %v1460_v38, %v3173_v48  ;;  %2303 = vpow2.f32 %v1971_v3 }
 0x293   : > { %v2290_v32 = vpop.eup %2289 }
 0x294   : > { %v1972_v42 = vmul.f32 -1.442695, %v1495_v41  ;;  %v2292_v47 = vpop.eup %2291  ;;  %v1555_v56 = vadd.f32 1.0, %v2290_v32 }
 0x295   : > { %v1462_v43 = vpop.permute.xlu1 %1461  ;;  %v2294_v20 = vpop.eup %2293  ;;  %v1554_v26 = vadd.f32 1.0, %v2292_v47 }
 0x296   : > { %v1496_v35 = vadd.f32 %v1462_v43, %v3174_v51  ;;  %2305 = vpow2.f32 %v1972_v42 }
 0x297   : > { %2307 = vrcp.f32 %v1550_v21 }
 0x298   : > { %v1973_v6 = vmul.f32 -1.442695, %v1496_v35  ;;  %2309 = vrcp.f32 %v1551_v18 }
 0x29a   : > { %2311 = vpow2.f32 %v1973_v6 }
 0x29b   : > { %v1464_v9 = vpop.permute.xlu0 %1463  ;;  %2313 = vrcp.f32 %v1553_v44  ;;  %v2296_v40 = vpop.eup %2295 }
 0x29c   : > { %v1497_v12 = vadd.f32 %v1464_v9, %v3175_v15  ;;  %2315 = vrcp.f32 %v1552_v2  ;;  %v2298_v39 = vpop.eup %2297  ;;  %v1557_v63 = vadd.f32 1.0, %v2296_v40 }
 0x29d   : > { %v2300_v11 = vpop.eup %2299  ;;  %v1556_v58 = vadd.f32 1.0, %v2298_v39 }
 0x29e   : > { %v1974_v22 = vmul.f32 -1.442695, %v1497_v12  ;;  %v2302_v37 = vpop.eup %2301 }
 0x29f   : > { %v1628_v45 = vpop.permute.xlu0 %1627  ;;  %v1466_v60 = vpop.permute.xlu1 %1465 }
 0x2a0   : > { %2317 = vpow2.f32 %v1974_v22  ;;  %v1675_v28 = vmul.f32 %v2294_v20, %v1628_v45  ;;  %v1498_v50 = vadd.f32 %v1466_v60, %v3176_v19  ;;  %v2304_v57 = vpop.eup %2303 }
 0x2a1   : > { %2319 = vrcp.f32 %v1555_v56  ;;  %v1558_v62 = vadd.f32 1.0, %v2304_v57 }
 0x2a2   : > { %1707 = vrot.lane.b32.xlu0 %v1675_v28, %s2347_s27  ;;  %2321 = vrcp.f32 %v1554_v26  ;;  %v1975_v25 = vmul.f32 -1.442695, %v1498_v50 }
 0x2a3   : > { %v1632_v36 = vpop.permute.xlu0 %1631  ;;  %v2306_v4 = vpop.eup %2305 }
 0x2a4   : > { %v1630_v13 = vpop.permute.xlu1 %1629  ;;  %v1677_v17 = vmul.f32 %v2302_v37, %v1632_v36  ;;  %2323 = vpow2.f32 %v1975_v25  ;;  %v2308_v27 = vpop.eup %2307  ;;  %v1559_v16 = vadd.f32 1.0, %v2306_v4 }
 0x2a5   : > { %v1676_v10 = vmul.f32 %v2300_v11, %v1630_v13  ;;  %2325 = vrcp.f32 %v1557_v63  ;;  %v2310_v30 = vpop.eup %2309 }
 0x2a6   : > { %1711 = vrot.lane.b32.xlu0 %v1677_v17, %s2347_s27  ;;  %2327 = vrcp.f32 %v1556_v58 }
 0x2a7   : > { %1709 = vrot.lane.b32.xlu1 %v1676_v10, %s2347_s27  ;;  %v1636_v38 = vpop.permute.xlu0 %1635  ;;  %v2312_v53 = vpop.eup %2311  ;;  %2329 = vrcp.f32 %v1559_v16 }
 0x2a8   : > { %v1634_v3 = vpop.permute.xlu1 %1633  ;;  %v1679_v48 = vmul.f32 %v2310_v30, %v1636_v38  ;;  %v2314_v8 = vpop.eup %2313  ;;  %2331 = vrcp.f32 %v1558_v62  ;;  %v1560_v42 = vadd.f32 1.0, %v2312_v53 }
 0x2a9   : > { %v1678_v41 = vmul.f32 %v2308_v27, %v1634_v3  ;;  %v2316_v43 = vpop.eup %2315 }
 0x2aa   : > { %1715 = vrot.lane.b32.xlu0 %v1679_v48, %s2347_s27  ;;  %2333 = vrcp.f32 %v1560_v42 }
 0x2ab   : > { %1713 = vrot.lane.b32.xlu1 %v1678_v41, %s2347_s27  ;;  %v1640_v21 = vpop.permute.xlu0 %1639 }
 0x2ac   : > { %v1638_v18 = vpop.permute.xlu1 %1637  ;;  %v1681_v51 = vmul.f32 %v2314_v8, %v1640_v21 }
 0x2ad   : > { %v2318_v35 = vpop.eup %2317  ;;  %v1680_v29 = vmul.f32 %v2316_v43, %v1638_v18 }
 0x2ae   : > { %v1561_v52 = vadd.f32 1.0, %v2318_v35  ;;  %1719 = vrot.lane.b32.xlu0 %v1681_v51, %s2347_s27  ;;  %v2320_v6 = vpop.eup %2319 }
 0x2af   : > { %1717 = vrot.lane.b32.xlu1 %v1680_v29, %s2347_s27  ;;  %v1644_v44 = vpop.permute.xlu0 %1643  ;;  %v2322_v32 = vpop.eup %2321 }
 0x2b0   : > { %2335 = vrcp.f32 %v1561_v52  ;;  %v1642_v2 = vpop.permute.xlu1 %1641  ;;  %v1683_v9 = vmul.f32 %v2320_v6, %v1644_v44 }
 0x2b1   : > { %v1682_v47 = vmul.f32 %v2322_v32, %v1642_v2  ;;  %v2324_v15 = vpop.eup %2323 }
 0x2b2   : > { %1723 = vrot.lane.b32.xlu0 %v1683_v9, %s2347_s27  ;;  %v2326_v12 = vpop.eup %2325  ;;  %v1562_v20 = vadd.f32 1.0, %v2324_v15 }
 0x2b3   : > { %1721 = vrot.lane.b32.xlu1 %v1682_v47, %s2347_s27  ;;  %v1648_v56 = vpop.permute.xlu0 %1647  ;;  %v2328_v22 = vpop.eup %2327 }
 0x2b4   : > { %v1646_v40 = vpop.permute.xlu1 %1645  ;;  %v1685_v26 = vmul.f32 %v2326_v12, %v1648_v56  ;;  %2337 = vrcp.f32 %v1562_v20  ;;  %v2330_v39 = vpop.eup %2329 }
 0x2b5   : > { %v1684_v45 = vmul.f32 %v2328_v22, %v1646_v40  ;;  %v2332_v28 = vpop.eup %2331 }
 0x2b6   : > { %1727 = vrot.lane.b32.xlu0 %v1685_v26, %s2347_s27 }
 0x2b7   : > { %1725 = vrot.lane.b32.xlu1 %v1684_v45, %s2347_s27  ;;  %v1652_v60 = vpop.permute.xlu0 %1651  ;;  %v2334_v37 = vpop.eup %2333 }
 0x2b8   : > { %v1650_v11 = vpop.permute.xlu1 %1649  ;;  %v1687_v19 = vmul.f32 %v2330_v39, %v1652_v60 }
 0x2b9   : > { %v1686_v50 = vmul.f32 %v2332_v28, %v1650_v11 }
 0x2ba   : > { %1731 = vrot.lane.b32.xlu0 %v1687_v19, %s2347_s27 }
 0x2bb   : > { %1729 = vrot.lane.b32.xlu1 %v1686_v50, %s2347_s27  ;;  %v1656_v25 = vpop.permute.xlu0 %1655 }
 0x2bc   : > { %v1654_v63 = vpop.permute.xlu1 %1653 }
 0x2bd   : > { %v2336_v57 = vpop.eup %2335  ;;  %v1688_v58 = vmul.f32 %v2334_v37, %v1654_v63 }
 0x2be   : > { %v1689_v36 = vmul.f32 %v2336_v57, %v1656_v25 }
 0x2bf   : > { %1733 = vrot.lane.b32.xlu1 %v1688_v58, %s2347_s27 }
 0x2c0   : > { %1735 = vrot.lane.b32.xlu0 %v1689_v36, %s2347_s27  ;;  %v1658_v13 = vpop.permute.xlu1 %1657 }
 0x2c1   : > { %v2338_v4 = vpop.eup %2337 }
 0x2c2   : > { %v1690_v17 = vmul.f32 %v2338_v4, %v1658_v13 }
 0x2c4   : > { %1737 = vrot.lane.b32.xlu1 %v1690_v17, %s2347_s27 }
 0x314   : > { %v1708_v10 = vpop.permute.xlu0 %1707 }
 0x315   : > { %1755 = vst.msk [vmem:[%s3062_s20] sm:$0xff] %vm1002_vm2, %v1708_v10 }
 0x316   : > { %1772 = vst.msk [vmem:[%s3062_s20] sm:$0xff] %vm1771_vm3, %v2897_v24 }
 0x318   : > { %v1712_v27 = vpop.permute.xlu0 %1711 }
 0x319   : > { %v1710_v16 = vpop.permute.xlu1 %1709  ;;  %1757 = vst.msk [vmem:[%s3062_s20 + $0x10] sm:$0xff] %vm1002_vm2, %v1712_v27 }
 0x31a   : > { %1756 = vst.msk [vmem:[%s3062_s20 + $0x8] sm:$0xff] %vm1002_vm2, %v1710_v16 }
 0x31b   : > { %1774 = vst.msk [vmem:[%s3062_s20 + $0x10] sm:$0xff] %vm1771_vm3, %v2908_v31  ;;  %1773 = vst.msk [vmem:[%s3062_s20 + $0x8] sm:$0xff] %vm1771_vm3, %v2902_v54 }
 0x31c   : > { %v1716_v30 = vpop.permute.xlu0 %1715 }
 0x31d   : > { %v1714_v24 = vpop.permute.xlu1 %1713  ;;  %1759 = vst.msk [vmem:[%s3062_s20 + $0x20] sm:$0xff] %vm1002_vm2, %v1716_v30 }
 0x31e   : > { %1758 = vst.msk [vmem:[%s3062_s20 + $0x18] sm:$0xff] %vm1002_vm2, %v1714_v24 }
 0x31f   : > { %1776 = vst.msk [vmem:[%s3062_s20 + $0x20] sm:$0xff] %vm1771_vm3, %v2920_v7  ;;  %1775 = vst.msk [vmem:[%s3062_s20 + $0x18] sm:$0xff] %vm1771_vm3, %v2914_v1 }
 0x320   : > { %v1720_v31 = vpop.permute.xlu0 %1719 }
 0x321   : > { %v1718_v54 = vpop.permute.xlu1 %1717  ;;  %1761 = vst.msk [vmem:[%s3062_s20 + $0x30] sm:$0xff] %vm1002_vm2, %v1720_v31 }
 0x322   : > { %1760 = vst.msk [vmem:[%s3062_s20 + $0x28] sm:$0xff] %vm1002_vm2, %v1718_v54 }
 0x323   : > { %1778 = vst.msk [vmem:[%s3062_s20 + $0x30] sm:$0xff] %vm1771_vm3, %v2932_v23  ;;  %1777 = vst.msk [vmem:[%s3062_s20 + $0x28] sm:$0xff] %vm1771_vm3, %v2926_v59 }
 0x324   : > { %v1724_v7 = vpop.permute.xlu0 %1723 }
 0x325   : > { %v1722_v1 = vpop.permute.xlu1 %1721  ;;  %1763 = vst.msk [vmem:[%s3062_s20 + $0x40] sm:$0xff] %vm1002_vm2, %v1724_v7 }
 0x326   : > { %1762 = vst.msk [vmem:[%s3062_s20 + $0x38] sm:$0xff] %vm1002_vm2, %v1722_v1 }
 0x327   : > { %1780 = vst.msk [vmem:[%s3062_s20 + $0x40] sm:$0xff] %vm1771_vm3, %v2944_v34  ;;  %1779 = vst.msk [vmem:[%s3062_s20 + $0x38] sm:$0xff] %vm1771_vm3, %v2938_v14 }
 0x328   : > { %v1728_v23 = vpop.permute.xlu0 %1727 }
 0x329   : > { %v1726_v59 = vpop.permute.xlu1 %1725  ;;  %1765 = vst.msk [vmem:[%s3062_s20 + $0x50] sm:$0xff] %vm1002_vm2, %v1728_v23 }
 0x32a   : > { %1764 = vst.msk [vmem:[%s3062_s20 + $0x48] sm:$0xff] %vm1002_vm2, %v1726_v59 }
 0x32b   : > { %1782 = vst.msk [vmem:[%s3062_s20 + $0x50] sm:$0xff] %vm1771_vm3, %v2956_v5  ;;  %1781 = vst.msk [vmem:[%s3062_s20 + $0x48] sm:$0xff] %vm1771_vm3, %v2950_v55 }
 0x32c   : > { %v1732_v34 = vpop.permute.xlu0 %1731 }
 0x32d   : > { %v1730_v62 = vpop.permute.xlu1 %1729  ;;  %1767 = vst.msk [vmem:[%s3062_s20 + $0x60] sm:$0xff] %vm1002_vm2, %v1732_v34 }
 0x32e   : > { %1766 = vst.msk [vmem:[%s3062_s20 + $0x58] sm:$0xff] %vm1002_vm2, %v1730_v62 }
 0x32f   : > { %1784 = vst.msk [vmem:[%s3062_s20 + $0x60] sm:$0xff] %vm1771_vm3, %v2968_v46  ;;  %1783 = vst.msk [vmem:[%s3062_s20 + $0x58] sm:$0xff] %vm1771_vm3, %v2962_v33 }
 0x331   : > { %v1734_v14 = vpop.permute.xlu1 %1733 }
 0x332   : > { %1768 = vst.msk [vmem:[%s3062_s20 + $0x68] sm:$0xff] %vm1002_vm2, %v1734_v14  ;;  %v1736_v5 = vpop.permute.xlu0 %1735 }
 0x333   : > { %1785 = vst.msk [vmem:[%s3062_s20 + $0x68] sm:$0xff] %vm1771_vm3, %v2976_v61 }
 0x334   : > { %1769 = vst.msk [vmem:[%s3062_s20 + $0x70] sm:$0xff] %vm1002_vm2, %v1736_v5 }
 0x335   : > { %1786 = vst.msk [vmem:[%s3062_s20 + $0x70] sm:$0xff] %vm1771_vm3, %v2986_v0 }
 0x336   : > { %v1738_v55 = vpop.permute.xlu1 %1737 }
 0x337   : > { %1770 = vst.msk [vmem:[%s3062_s20 + $0x78] sm:$0xff] %vm1002_vm2, %v1738_v55 }
 0x338   : > { %1787 = vst.msk [vmem:[%s3062_s20 + $0x78] sm:$0xff] %vm1771_vm3, %v2994_v49 }
 0x339 PF: > { %s15_s18 = sadd.s32 1, %s2345_s18  }
 0x33a   : > { %p12_p7 = scmp.ge.s32.totalorder %s15_s18, 6  }
 0x33c   :  { %14 = sbr.rel (!%p12_p7) target bundleno = 1 (0x1), region = 76 }

</bundles_post_ra>
